<compile_context>
chip_gen: v7x
topology: tpu7x:2x2x1
jax: 0.10.0
libtpu: 0.0.40
codegen_flags: <defaults>
</compile_context>

<pallas_src>
import functools

import jax
import jax.numpy as jnp
from jax import lax
from jax.experimental import pallas as pl
from jax.experimental.pallas import tpu as pltpu


# ---------------------------------------------------------------------------
# Primary kernel: Bt batch elements per grid step, fully vectorized over Bt.
# ---------------------------------------------------------------------------
def _gate_unit_batched_kernel(x_ref, w1t_ref, w2t_ref, taps_ref, out_ref):
    Bt, C, L = x_ref.shape
    x = x_ref[...]                                      # (Bt, C, L) f32

    # ---- channel attention -------------------------------------------------
    pmax = jnp.max(x, axis=2)                           # (Bt, C)
    pavg = jnp.sum(x, axis=2) * (1.0 / L)               # (Bt, C)

    w1t = w1t_ref[...]                                  # (C, C//16)
    w2t = w2t_ref[...]                                  # (C//16, C)

    def mlp(p):                                         # (Bt, C) -> (Bt, C)
        h = jnp.maximum(
            jnp.dot(p, w1t, preferred_element_type=jnp.float32), 0.0)
        return jnp.dot(h, w2t, preferred_element_type=jnp.float32)

    gate = jax.nn.sigmoid(mlp(pmax) + mlp(pavg))        # (Bt, C)
    xg = x * gate[:, :, None]                           # (Bt, C, L)

    # ---- spatial attention --------------------------------------------------
    cmax = jnp.max(xg, axis=1)                          # (Bt, L)
    cavg = jnp.sum(xg, axis=1) * (1.0 / C)              # (Bt, L)

    # 7-tap zero-padded cross-correlation over L. taps_ref row k holds the
    # conv weight for the max map (already multiplied by the boundary mask),
    # row 7 + k the weight for the avg map.
    acc = jnp.zeros((Bt, L), jnp.float32)
    for k in range(7):
        off = k - 3
        if off == 0:
            shm, sha = cmax, cavg
        else:
            shift = (-off) % L
            shm = pltpu.roll(cmax, shift, axis=1)
            sha = pltpu.roll(cavg, shift, axis=1)
        acc = acc + taps_ref[pl.ds(k, 1), :] * shm \
                  + taps_ref[pl.ds(7 + k, 1), :] * sha

    prob = jax.nn.sigmoid(acc)                          # (Bt, L)
    # Per-batch partial sums; the wrapper normalizes by B * L.
    out_ref[...] = jnp.sum(prob, axis=1, keepdims=True)   # (Bt, 1)


def gate_unit_batched(x, w1, w2, wc, *, block_bytes=2 * 1024 * 1024):
    B, C, L = x.shape
    C16 = w1.shape[0]

    x = x.astype(jnp.float32)
    w1t = jnp.asarray(w1, jnp.float32).T                # (C, C16)
    w2t = jnp.asarray(w2, jnp.float32).T                # (C16, C)
    wc = jnp.asarray(wc, jnp.float32)                   # (2, 7)

    # Precompute (conv weight x zero-padding mask) tap rows in the wrapper so
    # the kernel does no per-tap mask arithmetic or VMEM scalar extraction.
    idx = jnp.arange(L)
    rows = []
    for half in range(2):                               # 0: max map, 1: avg map
        for k in range(7):
            off = k - 3
            valid = ((idx + off >= 0) & (idx + off < L)).astype(jnp.float32)
            rows.append(valid * wc[half, k])
    taps = jnp.stack(rows, axis=0)                      # (14, L)

    # Batch-block size: biggest block that keeps the double-buffered input
    # comfortably inside scoped VMEM on every TPU generation (v7x has only
    # 64 MiB physical VMEM, so stay conservative).
    per_batch = C * L * 4
    bt = max(1, block_bytes // per_batch)
    if bt >= B:
        Bt = B                                          # single grid step
    else:
        Bt = max(8, (bt // 8) * 8)                      # (Bt, 1) out block: Bt % 8 == 0
    n_blocks = -(-B // Bt)
    B_pad = n_blocks * Bt
    if B_pad != B:
        x = jnp.pad(x, ((0, B_pad - B), (0, 0), (0, 0)))

    partial = pl.pallas_call(
        _gate_unit_batched_kernel,
        out_shape=jax.ShapeDtypeStruct((B_pad, 1), jnp.float32),
        grid_spec=pltpu.PrefetchScalarGridSpec(
            num_scalar_prefetch=0,
            grid=(n_blocks,),
            in_specs=[
                pl.BlockSpec((Bt, C, L), lambda g: (g, 0, 0)),
                pl.BlockSpec((C, C16), lambda g: (0, 0)),
                pl.BlockSpec((C16, C), lambda g: (0, 0)),
                pl.BlockSpec((14, L), lambda g: (0, 0)),
            ],
            out_specs=pl.BlockSpec((Bt, 1), lambda g: (g, 0)),
        ),
        compiler_params=pltpu.CompilerParams(
            dimension_semantics=("parallel",),
            vmem_limit_bytes=32 * 1024 * 1024,
        ),
    )(x, w1t, w2t, taps)

    return jnp.sum(partial[:B, 0]) / (B * L)


# ---------------------------------------------------------------------------
# Conservative fallback: one batch element per grid step (previously validated).
# ---------------------------------------------------------------------------
def _gate_unit_perbatch_kernel(x_ref, w1_ref, w2_ref, wc_ref, out_ref, *, B, C, L):
    b = pl.program_id(0)

    @pl.when(b == 0)
    def _():
        out_ref[...] = jnp.zeros_like(out_ref)

    x = x_ref[0]  # (C, L)

    pmax = jnp.max(x, axis=1, keepdims=True)            # (C, 1)
    pavg = jnp.mean(x, axis=1, keepdims=True)            # (C, 1)

    w1 = w1_ref[...]                                      # (C//16, C)
    w2 = w2_ref[...]                                      # (C, C//16)

    def mlp(p):
        h = jnp.maximum(
            jnp.dot(w1, p, preferred_element_type=jnp.float32), 0.0)
        return jnp.dot(w2, h, preferred_element_type=jnp.float32)

    channel_out = jax.nn.sigmoid(mlp(pmax) + mlp(pavg))   # (C, 1)
    xg = x * channel_out                                   # (C, L)

    cmax = jnp.max(xg, axis=0, keepdims=True)              # (1, L)
    cavg = jnp.mean(xg, axis=0, keepdims=True)             # (1, L)

    wc = wc_ref[...]                                       # (2, 7)
    idx = lax.broadcasted_iota(jnp.int32, (1, L), 1)
    acc = jnp.zeros((1, L), jnp.float32)
    for k in range(7):
        off = k - 3
        if off == 0:
            sm, sa = cmax, cavg
        else:
            shift = (-off) % L
            sm = pltpu.roll(cmax, shift, axis=1)
            sa = pltpu.roll(cavg, shift, axis=1)
        valid = (idx + off >= 0) & (idx + off < L)
        sm = jnp.where(valid, sm, 0.0)
        sa = jnp.where(valid, sa, 0.0)
        acc = acc + wc[0, k] * sm + wc[1, k] * sa

    prob = jax.nn.sigmoid(acc)
    out_ref[...] += jnp.sum(prob, keepdims=True) * (1.0 / (B * L))


def gate_unit_fallback(x, w1, w2, wc):
    B, C, L = x.shape
    C16 = w1.shape[0]
    kernel = functools.partial(_gate_unit_perbatch_kernel, B=B, C=C, L=L)
    out = pl.pallas_call(
        kernel,
        out_shape=jax.ShapeDtypeStruct((1, 1), jnp.float32),
        grid_spec=pltpu.PrefetchScalarGridSpec(
            num_scalar_prefetch=0,
            grid=(B,),
            in_specs=[
                pl.BlockSpec((1, C, L), lambda b: (b, 0, 0)),
                pl.BlockSpec((C16, C), lambda b: (0, 0)),
                pl.BlockSpec((C, C16), lambda b: (0, 0)),
                pl.BlockSpec((2, 7), lambda b: (0, 0)),
            ],
            out_specs=pl.BlockSpec((1, 1), lambda b: (0, 0)),
        ),
        compiler_params=pltpu.CompilerParams(
            dimension_semantics=("arbitrary",)),
    )(x, w1, w2, wc)
    return out[0, 0]


def gate_unit(x, w1, w2, wc, *, check_against=None):
    """Forward pass of GateUnitModule.

    Prefers the batched kernel; if that path fails to lower/run (or, when a
    reference is supplied, mismatches it) on the current TPU generation, the
    conservative per-batch kernel is used instead.
    """
    try:
        out = jax.block_until_ready(gate_unit_batched(x, w1, w2, wc))
        if check_against is not None and not jnp.allclose(
                out, check_against, rtol=1e-5, atol=1e-5):
            raise RuntimeError("batched kernel mismatch")
        return out
    except Exception:
        # TODO(synk): remove this fallback once the batched (Bt, C, L) path is
        # validated on every target TPU generation.
        return gate_unit_fallback(x, w1, w2, wc)


def gate_unit_reference(x, w1, w2, wc):
    """Pure-JAX reference matching the PyTorch forward."""
    pmax = jnp.max(x, axis=2, keepdims=True)
    pavg = jnp.mean(x, axis=2, keepdims=True)

    def mlp(p):  # (B, C, 1)
        h = jnp.maximum(jnp.einsum("oc,bcl->bol", w1, p), 0.0)
        return jnp.einsum("co,bol->bcl", w2, h)

    channel_out = jax.nn.sigmoid(mlp(pmax) + mlp(pavg))
    xg = x * channel_out
    cmax = jnp.max(xg, axis=1, keepdims=True)
    cavg = jnp.mean(xg, axis=1, keepdims=True)
    cat = jnp.concatenate([cmax, cavg], axis=1)  # (B, 2, L)
    conv = lax.conv_general_dilated(
        cat, wc.reshape(1, 2, 7), window_strides=(1,), padding=((3, 3),),
        dimension_numbers=("NCH", "OIH", "NCH"))
    return jnp.mean(jax.nn.sigmoid(conv))


if __name__ == "__main__":
    B, C, L = 2, 32, 128  # channels must be >= 16 (C // 16 hidden dim)
    C16 = C // 16

    key = jax.random.PRNGKey(0)
    kx, k1, k2, k3 = jax.random.split(key, 4)
    x = jax.random.normal(kx, (B, C, L), dtype=jnp.float32)
    # Conv1d(C, C//16, 1, bias=False).weight -> (C//16, C, 1); drop trailing 1
    w1 = jax.random.normal(k1, (C16, C), dtype=jnp.float32) * 0.1
    # Conv1d(C//16, C, 1, bias=False).weight -> (C, C//16, 1)
    w2 = jax.random.normal(k2, (C, C16), dtype=jnp.float32) * 0.1
    # Conv1d(2, 1, 7, padding=3, bias=False).weight -> (1, 2, 7); store as (2, 7)
    wc = jax.random.normal(k3, (2, 7), dtype=jnp.float32) * 0.1

    ref = jax.block_until_ready(gate_unit_reference(x, w1, w2, wc))
    out = jax.block_until_ready(gate_unit(x, w1, w2, wc, check_against=ref))

    assert jnp.allclose(out, ref, rtol=1e-5, atol=1e-5), (out, ref)
    print("KERNEL_OK")
</pallas_src>

<mosaic_0001>
module attributes {stable_mosaic.version = 11 : i64} {
  func.func @_gate_unit_batched_kernel(%arg0: i32, %arg1: memref<2x32x128xf32, #tpu.memory_space<vmem>>, %arg2: memref<32x2xf32, #tpu.memory_space<vmem>>, %arg3: memref<2x32xf32, #tpu.memory_space<vmem>>, %arg4: memref<14x128xf32, #tpu.memory_space<vmem>>, %arg5: memref<2x1xf32, #tpu.memory_space<vmem>>) attributes {dimension_semantics = [#tpu.dimension_semantics<parallel>], iteration_bounds = array<i64: 1>, scalar_prefetch = 0 : i64, scratch_operands = 0 : i64, tpu.core_type = #tpu.core_type<tc>, window_params = [{transform_indices = @transform_0, window_bounds = array<i64: 2, 32, 128>}, {pipeline_mode = #tpu.pipeline_mode<synchronous>, transform_indices = @transform_1, window_bounds = array<i64: 32, 2>}, {pipeline_mode = #tpu.pipeline_mode<synchronous>, transform_indices = @transform_2, window_bounds = array<i64: 2, 32>}, {pipeline_mode = #tpu.pipeline_mode<synchronous>, transform_indices = @transform_3, window_bounds = array<i64: 14, 128>}, {transform_indices = @transform_4, window_bounds = array<i64: 2, 1>}]} {
    %c0 = arith.constant 0 : index
    %c0_0 = arith.constant 0 : index
    %c0_1 = arith.constant 0 : index
    %0 = vector.load %arg1[%c0, %c0_0, %c0_1] : memref<2x32x128xf32, #tpu.memory_space<vmem>>, vector<2x32x128xf32>
    %cst = arith.constant dense<0xFF800000> : vector<2x32xf32>
    %1 = vector.multi_reduction <maximumf>, %0, %cst [2] : vector<2x32x128xf32> to vector<2x32xf32>
    %cst_2 = arith.constant dense<0.000000e+00> : vector<2x32xf32>
    %2 = vector.multi_reduction <add>, %0, %cst_2 [2] : vector<2x32x128xf32> to vector<2x32xf32>
    %cst_3 = arith.constant 7.812500e-03 : f32
    %3 = vector.broadcast %cst_3 : f32 to vector<2x32xf32>
    %4 = arith.mulf %2, %3 : vector<2x32xf32>
    %c0_4 = arith.constant 0 : index
    %c0_5 = arith.constant 0 : index
    %5 = vector.load %arg2[%c0_4, %c0_5] : memref<32x2xf32, #tpu.memory_space<vmem>>, vector<32x2xf32>
    %c0_6 = arith.constant 0 : index
    %c0_7 = arith.constant 0 : index
    %6 = vector.load %arg3[%c0_6, %c0_7] : memref<2x32xf32, #tpu.memory_space<vmem>>, vector<2x32xf32>
    %cst_8 = arith.constant dense<0.000000e+00> : vector<2x2xf32>
    %7 = tpu.matmul %1, %5, %cst_8 {dimension_numbers = #tpu.dot_dimension_numbers<[1], [0], [0], [1], [0, 0, 1, 1], [], []>} : vector<2x32xf32>, vector<32x2xf32>, vector<2x2xf32> -> vector<2x2xf32>
    %cst_9 = arith.constant 0.000000e+00 : f32
    %8 = vector.broadcast %cst_9 : f32 to vector<2x2xf32>
    %9 = arith.maximumf %7, %8 : vector<2x2xf32>
    %cst_10 = arith.constant dense<0.000000e+00> : vector<2x32xf32>
    %10 = tpu.matmul %9, %6, %cst_10 {dimension_numbers = #tpu.dot_dimension_numbers<[1], [0], [0], [1], [0, 0, 1, 1], [], []>} : vector<2x2xf32>, vector<2x32xf32>, vector<2x32xf32> -> vector<2x32xf32>
    %cst_11 = arith.constant dense<0.000000e+00> : vector<2x2xf32>
    %11 = tpu.matmul %4, %5, %cst_11 {dimension_numbers = #tpu.dot_dimension_numbers<[1], [0], [0], [1], [0, 0, 1, 1], [], []>} : vector<2x32xf32>, vector<32x2xf32>, vector<2x2xf32> -> vector<2x2xf32>
    %cst_12 = arith.constant 0.000000e+00 : f32
    %12 = vector.broadcast %cst_12 : f32 to vector<2x2xf32>
    %13 = arith.maximumf %11, %12 : vector<2x2xf32>
    %cst_13 = arith.constant dense<0.000000e+00> : vector<2x32xf32>
    %14 = tpu.matmul %13, %6, %cst_13 {dimension_numbers = #tpu.dot_dimension_numbers<[1], [0], [0], [1], [0, 0, 1, 1], [], []>} : vector<2x2xf32>, vector<2x32xf32>, vector<2x32xf32> -> vector<2x32xf32>
    %15 = arith.addf %10, %14 : vector<2x32xf32>
    %16 = arith.negf %15 : vector<2x32xf32>
    %17 = math.exp %16 : vector<2x32xf32>
    %cst_14 = arith.constant 1.000000e+00 : f32
    %18 = vector.broadcast %cst_14 : f32 to vector<2x32xf32>
    %19 = arith.addf %18, %17 : vector<2x32xf32>
    %20 = arith.divf %18, %19 : vector<2x32xf32>
    %21 = vector.shape_cast %20 : vector<2x32xf32> to vector<2x32x1xf32>
    %22 = vector.broadcast %21 : vector<2x32x1xf32> to vector<2x32x128xf32>
    %23 = arith.mulf %0, %22 : vector<2x32x128xf32>
    %cst_15 = arith.constant dense<0xFF800000> : vector<2x128xf32>
    %24 = vector.multi_reduction <maximumf>, %23, %cst_15 [1] : vector<2x32x128xf32> to vector<2x128xf32>
    %cst_16 = arith.constant dense<0.000000e+00> : vector<2x128xf32>
    %25 = vector.multi_reduction <add>, %23, %cst_16 [1] : vector<2x32x128xf32> to vector<2x128xf32>
    %cst_17 = arith.constant 3.125000e-02 : f32
    %26 = vector.broadcast %cst_17 : f32 to vector<2x128xf32>
    %27 = arith.mulf %25, %26 : vector<2x128xf32>
    %cst_18 = arith.constant 0.000000e+00 : f32
    %28 = vector.broadcast %cst_18 : f32 to vector<2x128xf32>
    %c3_i32 = arith.constant 3 : i32
    %29 = tpu.dynamic_rotate %24 by %c3_i32 dim 1 : vector<2x128xf32>, i32 -> vector<2x128xf32>
    %c3_i32_19 = arith.constant 3 : i32
    %30 = tpu.dynamic_rotate %27 by %c3_i32_19 dim 1 : vector<2x128xf32>, i32 -> vector<2x128xf32>
    %c0_20 = arith.constant 0 : index
    %c0_21 = arith.constant 0 : index
    %31 = vector.load %arg4[%c0_20, %c0_21] : memref<14x128xf32, #tpu.memory_space<vmem>>, vector<1x128xf32>
    %32 = vector.broadcast %31 : vector<1x128xf32> to vector<2x128xf32>
    %33 = arith.mulf %32, %29 : vector<2x128xf32>
    %34 = arith.addf %28, %33 : vector<2x128xf32>
    %c7 = arith.constant 7 : index
    %c0_22 = arith.constant 0 : index
    %35 = vector.load %arg4[%c7, %c0_22] : memref<14x128xf32, #tpu.memory_space<vmem>>, vector<1x128xf32>
    %36 = vector.broadcast %35 : vector<1x128xf32> to vector<2x128xf32>
    %37 = arith.mulf %36, %30 : vector<2x128xf32>
    %38 = arith.addf %34, %37 : vector<2x128xf32>
    %c2_i32 = arith.constant 2 : i32
    %39 = tpu.dynamic_rotate %24 by %c2_i32 dim 1 : vector<2x128xf32>, i32 -> vector<2x128xf32>
    %c2_i32_23 = arith.constant 2 : i32
    %40 = tpu.dynamic_rotate %27 by %c2_i32_23 dim 1 : vector<2x128xf32>, i32 -> vector<2x128xf32>
    %c1 = arith.constant 1 : index
    %c0_24 = arith.constant 0 : index
    %41 = vector.load %arg4[%c1, %c0_24] : memref<14x128xf32, #tpu.memory_space<vmem>>, vector<1x128xf32>
    %42 = vector.broadcast %41 : vector<1x128xf32> to vector<2x128xf32>
    %43 = arith.mulf %42, %39 : vector<2x128xf32>
    %44 = arith.addf %38, %43 : vector<2x128xf32>
    %c8 = arith.constant 8 : index
    %c0_25 = arith.constant 0 : index
    %45 = vector.load %arg4[%c8, %c0_25] : memref<14x128xf32, #tpu.memory_space<vmem>>, vector<1x128xf32>
    %46 = vector.broadcast %45 : vector<1x128xf32> to vector<2x128xf32>
    %47 = arith.mulf %46, %40 : vector<2x128xf32>
    %48 = arith.addf %44, %47 : vector<2x128xf32>
    %c1_i32 = arith.constant 1 : i32
    %49 = tpu.dynamic_rotate %24 by %c1_i32 dim 1 : vector<2x128xf32>, i32 -> vector<2x128xf32>
    %c1_i32_26 = arith.constant 1 : i32
    %50 = tpu.dynamic_rotate %27 by %c1_i32_26 dim 1 : vector<2x128xf32>, i32 -> vector<2x128xf32>
    %c2 = arith.constant 2 : index
    %c0_27 = arith.constant 0 : index
    %51 = vector.load %arg4[%c2, %c0_27] : memref<14x128xf32, #tpu.memory_space<vmem>>, vector<1x128xf32>
    %52 = vector.broadcast %51 : vector<1x128xf32> to vector<2x128xf32>
    %53 = arith.mulf %52, %49 : vector<2x128xf32>
    %54 = arith.addf %48, %53 : vector<2x128xf32>
    %c9 = arith.constant 9 : index
    %c0_28 = arith.constant 0 : index
    %55 = vector.load %arg4[%c9, %c0_28] : memref<14x128xf32, #tpu.memory_space<vmem>>, vector<1x128xf32>
    %56 = vector.broadcast %55 : vector<1x128xf32> to vector<2x128xf32>
    %57 = arith.mulf %56, %50 : vector<2x128xf32>
    %58 = arith.addf %54, %57 : vector<2x128xf32>
    %c3 = arith.constant 3 : index
    %c0_29 = arith.constant 0 : index
    %59 = vector.load %arg4[%c3, %c0_29] : memref<14x128xf32, #tpu.memory_space<vmem>>, vector<1x128xf32>
    %60 = vector.broadcast %59 : vector<1x128xf32> to vector<2x128xf32>
    %61 = arith.mulf %60, %24 : vector<2x128xf32>
    %62 = arith.addf %58, %61 : vector<2x128xf32>
    %c10 = arith.constant 10 : index
    %c0_30 = arith.constant 0 : index
    %63 = vector.load %arg4[%c10, %c0_30] : memref<14x128xf32, #tpu.memory_space<vmem>>, vector<1x128xf32>
    %64 = vector.broadcast %63 : vector<1x128xf32> to vector<2x128xf32>
    %65 = arith.mulf %64, %27 : vector<2x128xf32>
    %66 = arith.addf %62, %65 : vector<2x128xf32>
    %c127_i32 = arith.constant 127 : i32
    %67 = tpu.dynamic_rotate %24 by %c127_i32 dim 1 : vector<2x128xf32>, i32 -> vector<2x128xf32>
    %c127_i32_31 = arith.constant 127 : i32
    %68 = tpu.dynamic_rotate %27 by %c127_i32_31 dim 1 : vector<2x128xf32>, i32 -> vector<2x128xf32>
    %c4 = arith.constant 4 : index
    %c0_32 = arith.constant 0 : index
    %69 = vector.load %arg4[%c4, %c0_32] : memref<14x128xf32, #tpu.memory_space<vmem>>, vector<1x128xf32>
    %70 = vector.broadcast %69 : vector<1x128xf32> to vector<2x128xf32>
    %71 = arith.mulf %70, %67 : vector<2x128xf32>
    %72 = arith.addf %66, %71 : vector<2x128xf32>
    %c11 = arith.constant 11 : index
    %c0_33 = arith.constant 0 : index
    %73 = vector.load %arg4[%c11, %c0_33] : memref<14x128xf32, #tpu.memory_space<vmem>>, vector<1x128xf32>
    %74 = vector.broadcast %73 : vector<1x128xf32> to vector<2x128xf32>
    %75 = arith.mulf %74, %68 : vector<2x128xf32>
    %76 = arith.addf %72, %75 : vector<2x128xf32>
    %c126_i32 = arith.constant 126 : i32
    %77 = tpu.dynamic_rotate %24 by %c126_i32 dim 1 : vector<2x128xf32>, i32 -> vector<2x128xf32>
    %c126_i32_34 = arith.constant 126 : i32
    %78 = tpu.dynamic_rotate %27 by %c126_i32_34 dim 1 : vector<2x128xf32>, i32 -> vector<2x128xf32>
    %c5 = arith.constant 5 : index
    %c0_35 = arith.constant 0 : index
    %79 = vector.load %arg4[%c5, %c0_35] : memref<14x128xf32, #tpu.memory_space<vmem>>, vector<1x128xf32>
    %80 = vector.broadcast %79 : vector<1x128xf32> to vector<2x128xf32>
    %81 = arith.mulf %80, %77 : vector<2x128xf32>
    %82 = arith.addf %76, %81 : vector<2x128xf32>
    %c12 = arith.constant 12 : index
    %c0_36 = arith.constant 0 : index
    %83 = vector.load %arg4[%c12, %c0_36] : memref<14x128xf32, #tpu.memory_space<vmem>>, vector<1x128xf32>
    %84 = vector.broadcast %83 : vector<1x128xf32> to vector<2x128xf32>
    %85 = arith.mulf %84, %78 : vector<2x128xf32>
    %86 = arith.addf %82, %85 : vector<2x128xf32>
    %c125_i32 = arith.constant 125 : i32
    %87 = tpu.dynamic_rotate %24 by %c125_i32 dim 1 : vector<2x128xf32>, i32 -> vector<2x128xf32>
    %c125_i32_37 = arith.constant 125 : i32
    %88 = tpu.dynamic_rotate %27 by %c125_i32_37 dim 1 : vector<2x128xf32>, i32 -> vector<2x128xf32>
    %c6 = arith.constant 6 : index
    %c0_38 = arith.constant 0 : index
    %89 = vector.load %arg4[%c6, %c0_38] : memref<14x128xf32, #tpu.memory_space<vmem>>, vector<1x128xf32>
    %90 = vector.broadcast %89 : vector<1x128xf32> to vector<2x128xf32>
    %91 = arith.mulf %90, %87 : vector<2x128xf32>
    %92 = arith.addf %86, %91 : vector<2x128xf32>
    %c13 = arith.constant 13 : index
    %c0_39 = arith.constant 0 : index
    %93 = vector.load %arg4[%c13, %c0_39] : memref<14x128xf32, #tpu.memory_space<vmem>>, vector<1x128xf32>
    %94 = vector.broadcast %93 : vector<1x128xf32> to vector<2x128xf32>
    %95 = arith.mulf %94, %88 : vector<2x128xf32>
    %96 = arith.addf %92, %95 : vector<2x128xf32>
    %97 = arith.negf %96 : vector<2x128xf32>
    %98 = math.exp %97 : vector<2x128xf32>
    %cst_40 = arith.constant 1.000000e+00 : f32
    %99 = vector.broadcast %cst_40 : f32 to vector<2x128xf32>
    %100 = arith.addf %99, %98 : vector<2x128xf32>
    %101 = arith.divf %99, %100 : vector<2x128xf32>
    %cst_41 = arith.constant dense<0.000000e+00> : vector<2xf32>
    %102 = vector.multi_reduction <add>, %101, %cst_41 [1] : vector<2x128xf32> to vector<2xf32>
    %103 = vector.shape_cast %102 : vector<2xf32> to vector<2x1xf32>
    %c0_42 = arith.constant 0 : index
    %c0_43 = arith.constant 0 : index
    %104 = vector.load %arg5[%c0_42, %c0_43] : memref<2x1xf32, #tpu.memory_space<vmem>>, vector<2x1xf32>
    tpu.vector_store %arg5[%c0_42, %c0_43], %103 {strides = array<i32>} : memref<2x1xf32, #tpu.memory_space<vmem>>, vector<2x1xf32>,
    return
  }
  func.func @transform_0(%arg0: i32) -> (i32, i32, i32) {
    %c0_i32 = arith.constant 0 : i32
    %c0_i32_0 = arith.constant 0 : i32
    %c0_i32_1 = arith.constant 0 : i32
    return %arg0, %c0_i32, %c0_i32_0 : i32, i32, i32
  }
  func.func @transform_1(%arg0: i32) -> (i32, i32) {
    %c0_i32 = arith.constant 0 : i32
    %c0_i32_0 = arith.constant 0 : i32
    %c0_i32_1 = arith.constant 0 : i32
    return %c0_i32, %c0_i32_0 : i32, i32
  }
  func.func @transform_2(%arg0: i32) -> (i32, i32) {
    %c0_i32 = arith.constant 0 : i32
    %c0_i32_0 = arith.constant 0 : i32
    %c0_i32_1 = arith.constant 0 : i32
    return %c0_i32, %c0_i32_0 : i32, i32
  }
  func.func @transform_3(%arg0: i32) -> (i32, i32) {
    %c0_i32 = arith.constant 0 : i32
    %c0_i32_0 = arith.constant 0 : i32
    %c0_i32_1 = arith.constant 0 : i32
    return %c0_i32, %c0_i32_0 : i32, i32
  }
  func.func @transform_4(%arg0: i32) -> (i32, i32) {
    %c0_i32 = arith.constant 0 : i32
    %c0_i32_0 = arith.constant 0 : i32
    return %arg0, %c0_i32 : i32, i32
  }
}

module attributes {stable_mosaic.version = 11 : i64} {
  func.func @_gate_unit_perbatch_kernel(%arg0: i32, %arg1: memref<1x32x128xf32, #tpu.memory_space<vmem>>, %arg2: memref<2x32xf32, #tpu.memory_space<vmem>>, %arg3: memref<32x2xf32, #tpu.memory_space<vmem>>, %arg4: memref<2x7xf32, #tpu.memory_space<vmem>>, %arg5: memref<1x1xf32, #tpu.memory_space<vmem>>) attributes {dimension_semantics = [#tpu.dimension_semantics<arbitrary>], iteration_bounds = array<i64: 2>, scalar_prefetch = 0 : i64, scratch_operands = 0 : i64, tpu.core_type = #tpu.core_type<tc>, window_params = [{transform_indices = @transform_0, window_bounds = array<i64: 1, 32, 128>}, {pipeline_mode = #tpu.pipeline_mode<synchronous>, transform_indices = @transform_1, window_bounds = array<i64: 2, 32>}, {pipeline_mode = #tpu.pipeline_mode<synchronous>, transform_indices = @transform_2, window_bounds = array<i64: 32, 2>}, {pipeline_mode = #tpu.pipeline_mode<synchronous>, transform_indices = @transform_3, window_bounds = array<i64: 2, 7>}, {pipeline_mode = #tpu.pipeline_mode<synchronous>, transform_indices = @transform_4, window_bounds = array<i64: 1, 1>}]} {
    %c0_i32 = arith.constant 0 : i32
    %0 = arith.cmpi eq, %arg0, %c0_i32 : i32
    %1 = arith.extui %0 : i1 to i32
    %c0_i32_0 = arith.constant 0 : i32
    %2 = arith.cmpi ne, %1, %c0_i32_0 : i32
    scf.if %2 {
      %cst_73 = arith.constant 0.000000e+00 : f32
      %226 = vector.broadcast %cst_73 : f32 to vector<1x1xf32>
      %c0_74 = arith.constant 0 : index
      %c0_75 = arith.constant 0 : index
      %227 = vector.load %arg5[%c0_74, %c0_75] : memref<1x1xf32, #tpu.memory_space<vmem>>, vector<1x1xf32>
      tpu.vector_store %arg5[%c0_74, %c0_75], %226 {strides = array<i32>} : memref<1x1xf32, #tpu.memory_space<vmem>>, vector<1x1xf32>,
    } else {
    }
    %c0 = arith.constant 0 : index
    %c0_1 = arith.constant 0 : index
    %c0_2 = arith.constant 0 : index
    %3 = vector.load %arg1[%c0, %c0_1, %c0_2] : memref<1x32x128xf32, #tpu.memory_space<vmem>>, vector<1x32x128xf32>
    %4 = vector.shape_cast %3 : vector<1x32x128xf32> to vector<32x128xf32>
    %cst = arith.constant dense<0xFF800000> : vector<32xf32>
    %5 = vector.multi_reduction <maximumf>, %4, %cst [1] : vector<32x128xf32> to vector<32xf32>
    %6 = vector.shape_cast %5 : vector<32xf32> to vector<32x1xf32>
    %cst_3 = arith.constant dense<0.000000e+00> : vector<32xf32>
    %7 = vector.multi_reduction <add>, %4, %cst_3 [1] : vector<32x128xf32> to vector<32xf32>
    %8 = vector.shape_cast %7 : vector<32xf32> to vector<32x1xf32>
    %cst_4 = arith.constant 1.280000e+02 : f32
    %9 = vector.broadcast %cst_4 : f32 to vector<32x1xf32>
    %10 = arith.divf %8, %9 : vector<32x1xf32>
    %c0_5 = arith.constant 0 : index
    %c0_6 = arith.constant 0 : index
    %11 = vector.load %arg2[%c0_5, %c0_6] : memref<2x32xf32, #tpu.memory_space<vmem>>, vector<2x32xf32>
    %c0_7 = arith.constant 0 : index
    %c0_8 = arith.constant 0 : index
    %12 = vector.load %arg3[%c0_7, %c0_8] : memref<32x2xf32, #tpu.memory_space<vmem>>, vector<32x2xf32>
    %cst_9 = arith.constant dense<0.000000e+00> : vector<2x1xf32>
    %13 = tpu.matmul %11, %6, %cst_9 {dimension_numbers = #tpu.dot_dimension_numbers<[1], [0], [0], [1], [0, 0, 1, 1], [], []>} : vector<2x32xf32>, vector<32x1xf32>, vector<2x1xf32> -> vector<2x1xf32>
    %cst_10 = arith.constant 0.000000e+00 : f32
    %14 = vector.broadcast %cst_10 : f32 to vector<2x1xf32>
    %15 = arith.maximumf %13, %14 : vector<2x1xf32>
    %cst_11 = arith.constant dense<0.000000e+00> : vector<32x1xf32>
    %16 = tpu.matmul %12, %15, %cst_11 {dimension_numbers = #tpu.dot_dimension_numbers<[1], [0], [0], [1], [0, 0, 1, 1], [], []>} : vector<32x2xf32>, vector<2x1xf32>, vector<32x1xf32> -> vector<32x1xf32>
    %cst_12 = arith.constant dense<0.000000e+00> : vector<2x1xf32>
    %17 = tpu.matmul %11, %10, %cst_12 {dimension_numbers = #tpu.dot_dimension_numbers<[1], [0], [0], [1], [0, 0, 1, 1], [], []>} : vector<2x32xf32>, vector<32x1xf32>, vector<2x1xf32> -> vector<2x1xf32>
    %cst_13 = arith.constant 0.000000e+00 : f32
    %18 = vector.broadcast %cst_13 : f32 to vector<2x1xf32>
    %19 = arith.maximumf %17, %18 : vector<2x1xf32>
    %cst_14 = arith.constant dense<0.000000e+00> : vector<32x1xf32>
    %20 = tpu.matmul %12, %19, %cst_14 {dimension_numbers = #tpu.dot_dimension_numbers<[1], [0], [0], [1], [0, 0, 1, 1], [], []>} : vector<32x2xf32>, vector<2x1xf32>, vector<32x1xf32> -> vector<32x1xf32>
    %21 = arith.addf %16, %20 : vector<32x1xf32>
    %22 = arith.negf %21 : vector<32x1xf32>
    %23 = math.exp %22 : vector<32x1xf32>
    %cst_15 = arith.constant 1.000000e+00 : f32
    %24 = vector.broadcast %cst_15 : f32 to vector<32x1xf32>
    %25 = arith.addf %24, %23 : vector<32x1xf32>
    %26 = arith.divf %24, %25 : vector<32x1xf32>
    %27 = vector.broadcast %26 : vector<32x1xf32> to vector<32x128xf32>
    %28 = arith.mulf %4, %27 : vector<32x128xf32>
    %cst_16 = arith.constant dense<0xFF800000> : vector<128xf32>
    %29 = vector.multi_reduction <maximumf>, %28, %cst_16 [0] : vector<32x128xf32> to vector<128xf32>
    %30 = vector.shape_cast %29 : vector<128xf32> to vector<1x128xf32>
    %cst_17 = arith.constant dense<0.000000e+00> : vector<128xf32>
    %31 = vector.multi_reduction <add>, %28, %cst_17 [0] : vector<32x128xf32> to vector<128xf32>
    %32 = vector.shape_cast %31 : vector<128xf32> to vector<1x128xf32>
    %cst_18 = arith.constant 3.200000e+01 : f32
    %33 = vector.broadcast %cst_18 : f32 to vector<1x128xf32>
    %34 = arith.divf %32, %33 : vector<1x128xf32>
    %c0_19 = arith.constant 0 : index
    %c0_20 = arith.constant 0 : index
    %35 = vector.load %arg4[%c0_19, %c0_20] : memref<2x7xf32, #tpu.memory_space<vmem>>, vector<2x7xf32>
    %36 = tpu.iota {dimensions = array<i32: 1>} : vector<1x128xi32>
    %cst_21 = arith.constant 0.000000e+00 : f32
    %37 = vector.broadcast %cst_21 : f32 to vector<1x128xf32>
    %c3_i32 = arith.constant 3 : i32
    %38 = tpu.dynamic_rotate %30 by %c3_i32 dim 1 : vector<1x128xf32>, i32 -> vector<1x128xf32>
    %c3_i32_22 = arith.constant 3 : i32
    %39 = tpu.dynamic_rotate %34 by %c3_i32_22 dim 1 : vector<1x128xf32>, i32 -> vector<1x128xf32>
    %c-3_i32 = arith.constant -3 : i32
    %40 = vector.broadcast %c-3_i32 : i32 to vector<1x128xi32>
    %41 = arith.addi %36, %40 : vector<1x128xi32>
    %c0_i32_23 = arith.constant 0 : i32
    %42 = vector.broadcast %c0_i32_23 : i32 to vector<1x128xi32>
    %43 = arith.cmpi sge, %41, %42 : vector<1x128xi32>
    %c-3_i32_24 = arith.constant -3 : i32
    %44 = vector.broadcast %c-3_i32_24 : i32 to vector<1x128xi32>
    %45 = arith.addi %36, %44 : vector<1x128xi32>
    %c128_i32 = arith.constant 128 : i32
    %46 = vector.broadcast %c128_i32 : i32 to vector<1x128xi32>
    %47 = arith.cmpi slt, %45, %46 : vector<1x128xi32>
    %48 = arith.andi %43, %47 : vector<1x128xi1>
    %cst_25 = arith.constant 0.000000e+00 : f32
    %49 = vector.broadcast %cst_25 : f32 to vector<1x128xf32>
    %50 = arith.select %48, %38, %49 : vector<1x128xi1>, vector<1x128xf32>
    %cst_26 = arith.constant 0.000000e+00 : f32
    %51 = vector.broadcast %cst_26 : f32 to vector<1x128xf32>
    %52 = arith.select %48, %39, %51 : vector<1x128xi1>, vector<1x128xf32>
    %53 = vector.extract_strided_slice %35 {offsets = [0, 0], sizes = [1, 1], strides = [1, 1]} : vector<2x7xf32> to vector<1x1xf32>
    %54 = vector.extract %53[0, 0] : f32 from vector<1x1xf32>
    %55 = vector.broadcast %54 : f32 to vector<1x128xf32>
    %56 = arith.mulf %55, %50 : vector<1x128xf32>
    %57 = arith.addf %37, %56 : vector<1x128xf32>
    %58 = vector.extract_strided_slice %35 {offsets = [1, 0], sizes = [1, 1], strides = [1, 1]} : vector<2x7xf32> to vector<1x1xf32>
    %59 = vector.extract %58[0, 0] : f32 from vector<1x1xf32>
    %60 = vector.broadcast %59 : f32 to vector<1x128xf32>
    %61 = arith.mulf %60, %52 : vector<1x128xf32>
    %62 = arith.addf %57, %61 : vector<1x128xf32>
    %c2_i32 = arith.constant 2 : i32
    %63 = tpu.dynamic_rotate %30 by %c2_i32 dim 1 : vector<1x128xf32>, i32 -> vector<1x128xf32>
    %c2_i32_27 = arith.constant 2 : i32
    %64 = tpu.dynamic_rotate %34 by %c2_i32_27 dim 1 : vector<1x128xf32>, i32 -> vector<1x128xf32>
    %c-2_i32 = arith.constant -2 : i32
    %65 = vector.broadcast %c-2_i32 : i32 to vector<1x128xi32>
    %66 = arith.addi %36, %65 : vector<1x128xi32>
    %c0_i32_28 = arith.constant 0 : i32
    %67 = vector.broadcast %c0_i32_28 : i32 to vector<1x128xi32>
    %68 = arith.cmpi sge, %66, %67 : vector<1x128xi32>
    %c-2_i32_29 = arith.constant -2 : i32
    %69 = vector.broadcast %c-2_i32_29 : i32 to vector<1x128xi32>
    %70 = arith.addi %36, %69 : vector<1x128xi32>
    %c128_i32_30 = arith.constant 128 : i32
    %71 = vector.broadcast %c128_i32_30 : i32 to vector<1x128xi32>
    %72 = arith.cmpi slt, %70, %71 : vector<1x128xi32>
    %73 = arith.andi %68, %72 : vector<1x128xi1>
    %cst_31 = arith.constant 0.000000e+00 : f32
    %74 = vector.broadcast %cst_31 : f32 to vector<1x128xf32>
    %75 = arith.select %73, %63, %74 : vector<1x128xi1>, vector<1x128xf32>
    %cst_32 = arith.constant 0.000000e+00 : f32
    %76 = vector.broadcast %cst_32 : f32 to vector<1x128xf32>
    %77 = arith.select %73, %64, %76 : vector<1x128xi1>, vector<1x128xf32>
    %78 = vector.extract_strided_slice %35 {offsets = [0, 1], sizes = [1, 1], strides = [1, 1]} : vector<2x7xf32> to vector<1x1xf32>
    %79 = vector.extract %78[0, 0] : f32 from vector<1x1xf32>
    %80 = vector.broadcast %79 : f32 to vector<1x128xf32>
    %81 = arith.mulf %80, %75 : vector<1x128xf32>
    %82 = arith.addf %62, %81 : vector<1x128xf32>
    %83 = vector.extract_strided_slice %35 {offsets = [1, 1], sizes = [1, 1], strides = [1, 1]} : vector<2x7xf32> to vector<1x1xf32>
    %84 = vector.extract %83[0, 0] : f32 from vector<1x1xf32>
    %85 = vector.broadcast %84 : f32 to vector<1x128xf32>
    %86 = arith.mulf %85, %77 : vector<1x128xf32>
    %87 = arith.addf %82, %86 : vector<1x128xf32>
    %c1_i32 = arith.constant 1 : i32
    %88 = tpu.dynamic_rotate %30 by %c1_i32 dim 1 : vector<1x128xf32>, i32 -> vector<1x128xf32>
    %c1_i32_33 = arith.constant 1 : i32
    %89 = tpu.dynamic_rotate %34 by %c1_i32_33 dim 1 : vector<1x128xf32>, i32 -> vector<1x128xf32>
    %c-1_i32 = arith.constant -1 : i32
    %90 = vector.broadcast %c-1_i32 : i32 to vector<1x128xi32>
    %91 = arith.addi %36, %90 : vector<1x128xi32>
    %c0_i32_34 = arith.constant 0 : i32
    %92 = vector.broadcast %c0_i32_34 : i32 to vector<1x128xi32>
    %93 = arith.cmpi sge, %91, %92 : vector<1x128xi32>
    %c-1_i32_35 = arith.constant -1 : i32
    %94 = vector.broadcast %c-1_i32_35 : i32 to vector<1x128xi32>
    %95 = arith.addi %36, %94 : vector<1x128xi32>
    %c128_i32_36 = arith.constant 128 : i32
    %96 = vector.broadcast %c128_i32_36 : i32 to vector<1x128xi32>
    %97 = arith.cmpi slt, %95, %96 : vector<1x128xi32>
    %98 = arith.andi %93, %97 : vector<1x128xi1>
    %cst_37 = arith.constant 0.000000e+00 : f32
    %99 = vector.broadcast %cst_37 : f32 to vector<1x128xf32>
    %100 = arith.select %98, %88, %99 : vector<1x128xi1>, vector<1x128xf32>
    %cst_38 = arith.constant 0.000000e+00 : f32
    %101 = vector.broadcast %cst_38 : f32 to vector<1x128xf32>
    %102 = arith.select %98, %89, %101 : vector<1x128xi1>, vector<1x128xf32>
    %103 = vector.extract_strided_slice %35 {offsets = [0, 2], sizes = [1, 1], strides = [1, 1]} : vector<2x7xf32> to vector<1x1xf32>
    %104 = vector.extract %103[0, 0] : f32 from vector<1x1xf32>
    %105 = vector.broadcast %104 : f32 to vector<1x128xf32>
    %106 = arith.mulf %105, %100 : vector<1x128xf32>
    %107 = arith.addf %87, %106 : vector<1x128xf32>
    %108 = vector.extract_strided_slice %35 {offsets = [1, 2], sizes = [1, 1], strides = [1, 1]} : vector<2x7xf32> to vector<1x1xf32>
    %109 = vector.extract %108[0, 0] : f32 from vector<1x1xf32>
    %110 = vector.broadcast %109 : f32 to vector<1x128xf32>
    %111 = arith.mulf %110, %102 : vector<1x128xf32>
    %112 = arith.addf %107, %111 : vector<1x128xf32>
    %c0_i32_39 = arith.constant 0 : i32
    %113 = vector.broadcast %c0_i32_39 : i32 to vector<1x128xi32>
    %114 = arith.addi %36, %113 : vector<1x128xi32>
    %c0_i32_40 = arith.constant 0 : i32
    %115 = vector.broadcast %c0_i32_40 : i32 to vector<1x128xi32>
    %116 = arith.cmpi sge, %114, %115 : vector<1x128xi32>
    %c0_i32_41 = arith.constant 0 : i32
    %117 = vector.broadcast %c0_i32_41 : i32 to vector<1x128xi32>
    %118 = arith.addi %36, %117 : vector<1x128xi32>
    %c128_i32_42 = arith.constant 128 : i32
    %119 = vector.broadcast %c128_i32_42 : i32 to vector<1x128xi32>
    %120 = arith.cmpi slt, %118, %119 : vector<1x128xi32>
    %121 = arith.andi %116, %120 : vector<1x128xi1>
    %cst_43 = arith.constant 0.000000e+00 : f32
    %122 = vector.broadcast %cst_43 : f32 to vector<1x128xf32>
    %123 = arith.select %121, %30, %122 : vector<1x128xi1>, vector<1x128xf32>
    %cst_44 = arith.constant 0.000000e+00 : f32
    %124 = vector.broadcast %cst_44 : f32 to vector<1x128xf32>
    %125 = arith.select %121, %34, %124 : vector<1x128xi1>, vector<1x128xf32>
    %126 = vector.extract_strided_slice %35 {offsets = [0, 3], sizes = [1, 1], strides = [1, 1]} : vector<2x7xf32> to vector<1x1xf32>
    %127 = vector.extract %126[0, 0] : f32 from vector<1x1xf32>
    %128 = vector.broadcast %127 : f32 to vector<1x128xf32>
    %129 = arith.mulf %128, %123 : vector<1x128xf32>
    %130 = arith.addf %112, %129 : vector<1x128xf32>
    %131 = vector.extract_strided_slice %35 {offsets = [1, 3], sizes = [1, 1], strides = [1, 1]} : vector<2x7xf32> to vector<1x1xf32>
    %132 = vector.extract %131[0, 0] : f32 from vector<1x1xf32>
    %133 = vector.broadcast %132 : f32 to vector<1x128xf32>
    %134 = arith.mulf %133, %125 : vector<1x128xf32>
    %135 = arith.addf %130, %134 : vector<1x128xf32>
    %c127_i32 = arith.constant 127 : i32
    %136 = tpu.dynamic_rotate %30 by %c127_i32 dim 1 : vector<1x128xf32>, i32 -> vector<1x128xf32>
    %c127_i32_45 = arith.constant 127 : i32
    %137 = tpu.dynamic_rotate %34 by %c127_i32_45 dim 1 : vector<1x128xf32>, i32 -> vector<1x128xf32>
    %c1_i32_46 = arith.constant 1 : i32
    %138 = vector.broadcast %c1_i32_46 : i32 to vector<1x128xi32>
    %139 = arith.addi %36, %138 : vector<1x128xi32>
    %c0_i32_47 = arith.constant 0 : i32
    %140 = vector.broadcast %c0_i32_47 : i32 to vector<1x128xi32>
    %141 = arith.cmpi sge, %139, %140 : vector<1x128xi32>
    %c1_i32_48 = arith.constant 1 : i32
    %142 = vector.broadcast %c1_i32_48 : i32 to vector<1x128xi32>
    %143 = arith.addi %36, %142 : vector<1x128xi32>
    %c128_i32_49 = arith.constant 128 : i32
    %144 = vector.broadcast %c128_i32_49 : i32 to vector<1x128xi32>
    %145 = arith.cmpi slt, %143, %144 : vector<1x128xi32>
    %146 = arith.andi %141, %145 : vector<1x128xi1>
    %cst_50 = arith.constant 0.000000e+00 : f32
    %147 = vector.broadcast %cst_50 : f32 to vector<1x128xf32>
    %148 = arith.select %146, %136, %147 : vector<1x128xi1>, vector<1x128xf32>
    %cst_51 = arith.constant 0.000000e+00 : f32
    %149 = vector.broadcast %cst_51 : f32 to vector<1x128xf32>
    %150 = arith.select %146, %137, %149 : vector<1x128xi1>, vector<1x128xf32>
    %151 = vector.extract_strided_slice %35 {offsets = [0, 4], sizes = [1, 1], strides = [1, 1]} : vector<2x7xf32> to vector<1x1xf32>
    %152 = vector.extract %151[0, 0] : f32 from vector<1x1xf32>
    %153 = vector.broadcast %152 : f32 to vector<1x128xf32>
    %154 = arith.mulf %153, %148 : vector<1x128xf32>
    %155 = arith.addf %135, %154 : vector<1x128xf32>
    %156 = vector.extract_strided_slice %35 {offsets = [1, 4], sizes = [1, 1], strides = [1, 1]} : vector<2x7xf32> to vector<1x1xf32>
    %157 = vector.extract %156[0, 0] : f32 from vector<1x1xf32>
    %158 = vector.broadcast %157 : f32 to vector<1x128xf32>
    %159 = arith.mulf %158, %150 : vector<1x128xf32>
    %160 = arith.addf %155, %159 : vector<1x128xf32>
    %c126_i32 = arith.constant 126 : i32
    %161 = tpu.dynamic_rotate %30 by %c126_i32 dim 1 : vector<1x128xf32>, i32 -> vector<1x128xf32>
    %c126_i32_52 = arith.constant 126 : i32
    %162 = tpu.dynamic_rotate %34 by %c126_i32_52 dim 1 : vector<1x128xf32>, i32 -> vector<1x128xf32>
    %c2_i32_53 = arith.constant 2 : i32
    %163 = vector.broadcast %c2_i32_53 : i32 to vector<1x128xi32>
    %164 = arith.addi %36, %163 : vector<1x128xi32>
    %c0_i32_54 = arith.constant 0 : i32
    %165 = vector.broadcast %c0_i32_54 : i32 to vector<1x128xi32>
    %166 = arith.cmpi sge, %164, %165 : vector<1x128xi32>
    %c2_i32_55 = arith.constant 2 : i32
    %167 = vector.broadcast %c2_i32_55 : i32 to vector<1x128xi32>
    %168 = arith.addi %36, %167 : vector<1x128xi32>
    %c128_i32_56 = arith.constant 128 : i32
    %169 = vector.broadcast %c128_i32_56 : i32 to vector<1x128xi32>
    %170 = arith.cmpi slt, %168, %169 : vector<1x128xi32>
    %171 = arith.andi %166, %170 : vector<1x128xi1>
    %cst_57 = arith.constant 0.000000e+00 : f32
    %172 = vector.broadcast %cst_57 : f32 to vector<1x128xf32>
    %173 = arith.select %171, %161, %172 : vector<1x128xi1>, vector<1x128xf32>
    %cst_58 = arith.constant 0.000000e+00 : f32
    %174 = vector.broadcast %cst_58 : f32 to vector<1x128xf32>
    %175 = arith.select %171, %162, %174 : vector<1x128xi1>, vector<1x128xf32>
    %176 = vector.extract_strided_slice %35 {offsets = [0, 5], sizes = [1, 1], strides = [1, 1]} : vector<2x7xf32> to vector<1x1xf32>
    %177 = vector.extract %176[0, 0] : f32 from vector<1x1xf32>
    %178 = vector.broadcast %177 : f32 to vector<1x128xf32>
    %179 = arith.mulf %178, %173 : vector<1x128xf32>
    %180 = arith.addf %160, %179 : vector<1x128xf32>
    %181 = vector.extract_strided_slice %35 {offsets = [1, 5], sizes = [1, 1], strides = [1, 1]} : vector<2x7xf32> to vector<1x1xf32>
    %182 = vector.extract %181[0, 0] : f32 from vector<1x1xf32>
    %183 = vector.broadcast %182 : f32 to vector<1x128xf32>
    %184 = arith.mulf %183, %175 : vector<1x128xf32>
    %185 = arith.addf %180, %184 : vector<1x128xf32>
    %c125_i32 = arith.constant 125 : i32
    %186 = tpu.dynamic_rotate %30 by %c125_i32 dim 1 : vector<1x128xf32>, i32 -> vector<1x128xf32>
    %c125_i32_59 = arith.constant 125 : i32
    %187 = tpu.dynamic_rotate %34 by %c125_i32_59 dim 1 : vector<1x128xf32>, i32 -> vector<1x128xf32>
    %c3_i32_60 = arith.constant 3 : i32
    %188 = vector.broadcast %c3_i32_60 : i32 to vector<1x128xi32>
    %189 = arith.addi %36, %188 : vector<1x128xi32>
    %c0_i32_61 = arith.constant 0 : i32
    %190 = vector.broadcast %c0_i32_61 : i32 to vector<1x128xi32>
    %191 = arith.cmpi sge, %189, %190 : vector<1x128xi32>
    %c3_i32_62 = arith.constant 3 : i32
    %192 = vector.broadcast %c3_i32_62 : i32 to vector<1x128xi32>
    %193 = arith.addi %36, %192 : vector<1x128xi32>
    %c128_i32_63 = arith.constant 128 : i32
    %194 = vector.broadcast %c128_i32_63 : i32 to vector<1x128xi32>
    %195 = arith.cmpi slt, %193, %194 : vector<1x128xi32>
    %196 = arith.andi %191, %195 : vector<1x128xi1>
    %cst_64 = arith.constant 0.000000e+00 : f32
    %197 = vector.broadcast %cst_64 : f32 to vector<1x128xf32>
    %198 = arith.select %196, %186, %197 : vector<1x128xi1>, vector<1x128xf32>
    %cst_65 = arith.constant 0.000000e+00 : f32
    %199 = vector.broadcast %cst_65 : f32 to vector<1x128xf32>
    %200 = arith.select %196, %187, %199 : vector<1x128xi1>, vector<1x128xf32>
    %201 = vector.extract_strided_slice %35 {offsets = [0, 6], sizes = [1, 1], strides = [1, 1]} : vector<2x7xf32> to vector<1x1xf32>
    %202 = vector.extract %201[0, 0] : f32 from vector<1x1xf32>
    %203 = vector.broadcast %202 : f32 to vector<1x128xf32>
    %204 = arith.mulf %203, %198 : vector<1x128xf32>
    %205 = arith.addf %185, %204 : vector<1x128xf32>
    %206 = vector.extract_strided_slice %35 {offsets = [1, 6], sizes = [1, 1], strides = [1, 1]} : vector<2x7xf32> to vector<1x1xf32>
    %207 = vector.extract %206[0, 0] : f32 from vector<1x1xf32>
    %208 = vector.broadcast %207 : f32 to vector<1x128xf32>
    %209 = arith.mulf %208, %200 : vector<1x128xf32>
    %210 = arith.addf %205, %209 : vector<1x128xf32>
    %211 = arith.negf %210 : vector<1x128xf32>
    %212 = math.exp %211 : vector<1x128xf32>
    %cst_66 = arith.constant 1.000000e+00 : f32
    %213 = vector.broadcast %cst_66 : f32 to vector<1x128xf32>
    %214 = arith.addf %213, %212 : vector<1x128xf32>
    %215 = arith.divf %213, %214 : vector<1x128xf32>
    %c0_67 = arith.constant 0 : index
    %c0_68 = arith.constant 0 : index
    %216 = vector.load %arg5[%c0_67, %c0_68] : memref<1x1xf32, #tpu.memory_space<vmem>>, vector<1x1xf32>
    %217 = vector.shape_cast %215 : vector<1x128xf32> to vector<1x1x128xf32>
    %cst_69 = arith.constant dense<0.000000e+00> : vector<1xf32>
    %218 = vector.multi_reduction <add>, %217, %cst_69 [1, 2] : vector<1x1x128xf32> to vector<1xf32>
    %219 = vector.shape_cast %218 : vector<1xf32> to vector<1x1x1xf32>
    %220 = vector.extract %219[0, 0, 0] : f32 from vector<1x1x1xf32>
    %221 = vector.broadcast %220 : f32 to vector<1x1xf32>
    %cst_70 = arith.constant 3.906250e-03 : f32
    %222 = vector.broadcast %cst_70 : f32 to vector<1x1xf32>
    %223 = arith.mulf %221, %222 : vector<1x1xf32>
    %224 = arith.addf %216, %223 : vector<1x1xf32>
    %c0_71 = arith.constant 0 : index
    %c0_72 = arith.constant 0 : index
    %225 = vector.load %arg5[%c0_71, %c0_72] : memref<1x1xf32, #tpu.memory_space<vmem>>, vector<1x1xf32>
    tpu.vector_store %arg5[%c0_71, %c0_72], %224 {strides = array<i32>} : memref<1x1xf32, #tpu.memory_space<vmem>>, vector<1x1xf32>,
    return
  }
  func.func @transform_0(%arg0: i32) -> (i32, i32, i32) {
    %c0_i32 = arith.constant 0 : i32
    %c0_i32_0 = arith.constant 0 : i32
    %c0_i32_1 = arith.constant 0 : i32
    return %arg0, %c0_i32, %c0_i32_0 : i32, i32, i32
  }
  func.func @transform_1(%arg0: i32) -> (i32, i32) {
    %c0_i32 = arith.constant 0 : i32
    %c0_i32_0 = arith.constant 0 : i32
    %c0_i32_1 = arith.constant 0 : i32
    return %c0_i32, %c0_i32_0 : i32, i32
  }
  func.func @transform_2(%arg0: i32) -> (i32, i32) {
    %c0_i32 = arith.constant 0 : i32
    %c0_i32_0 = arith.constant 0 : i32
    %c0_i32_1 = arith.constant 0 : i32
    return %c0_i32, %c0_i32_0 : i32, i32
  }
  func.func @transform_3(%arg0: i32) -> (i32, i32) {
    %c0_i32 = arith.constant 0 : i32
    %c0_i32_0 = arith.constant 0 : i32
    %c0_i32_1 = arith.constant 0 : i32
    return %c0_i32, %c0_i32_0 : i32, i32
  }
  func.func @transform_4(%arg0: i32) -> (i32, i32) {
    %c0_i32 = arith.constant 0 : i32
    %c0_i32_0 = arith.constant 0 : i32
    %c0_i32_1 = arith.constant 0 : i32
    return %c0_i32, %c0_i32_0 : i32, i32
  }
}

</mosaic_0001>

<bundles_post_ra>
// kernel: tpu_custom_call.1
= control target key start
LH: loop header
LB: loop body
LE: loop exit
PB: predicated region body
PF: predicated region fallthrough
CT: control target
= control target key end

     0   :  { %9 = vsyncpa [#allocation3], 0  ;;  %s846_s15 = smov [#allocation2]   ;;  %s1034_s0 = inlined_call_operand.hbm [shape: f32[2,32,128], index: 0, kind: input, shape index: {}]   ;;  %s1035_s1 = inlined_call_operand.vmem [shape: f32[32,2], index: 1, kind: input, shape index: {}]   ;;  %s1036_s2 = inlined_call_operand.vmem [shape: f32[2,32], index: 2, kind: input, shape index: {}]   ;;  %s1037_s3 = inlined_call_operand.vmem [shape: f32[14,128], index: 3, kind: input, shape index: {}]   ;;  %s1038_s4 = inlined_call_operand.vmem [shape: f32[2,1], index: 4, kind: output, shape index: {}]  }
   0x1   :  { %s15_s16 = sshll.u32 %s846_s15, 4  ;;  %s822_s19 = scalar_lea.hbm %s1034_s0, 1024  ;;  %s16_s16 = int_to_ptr.vmem [resolvable:$true] %s15_s16 }
   0x2   :  { %p823_p0 = scmp.ne.s32.totalorder %s1034_s0, %s822_s19  ;;  %p826_p1 = scmp.lt.u32.totalorder %s822_s19, %s1034_s0 }
   0x4   :  { %p828_p2 = pnand %p826_p1, %p823_p0 }
   0x6   :  { %831 = shalt.err (!%p828_p2)
}
   0x7   :  { %s832_s24 = scalar_lea.vmem %s16_s16, 1024  ;;  %p837_p4 = scmp.lt.s32.totalorder %s16_s16, %s16_s16 }
   0x8   :  { %p833_p3 = scmp.ne.s32.totalorder %s16_s16, %s832_s24  ;;  %p838_p5 = scmp.lt.s32.totalorder %s832_s24, %s832_s24 }
   0xa   :  { %p839_p6 = por %p838_p5, %p837_p4 }
   0xc   :  { %p840_p7 = pnand %p839_p6, %p833_p3 }
   0xe   :  { %843 = shalt.err (!%p840_p7)
}
   0xf   :  { %s847_s25 = smov 128   ;;  %s848_s26 = smov 8  }
  0x10   :  { %21 = dma.hbm_to_vmem [thread:$0]  %s1034_s0, 1024, %s16_s16, [#allocation3], %s847_s25, %s847_s25, %s848_s26  }
  0x11   :  { %844 = dma.done.wait [#allocation3], 1024  }
  0x12   :  { %845 = vsyncadd [#allocation3], 4294966272  ;;  %v895_v0 = vld [vmem:[#allocation2 + $0x20] sm:$0xff]  ;;  %v901_v2 = vld [vmem:[#allocation2 + $0x28] sm:$0xff]  ;;  %v849_v11 = vmov 0.0|0.0   ;;  %vm850_vm0 = vmmov 0   ;;  %v92_v20 = vlaneseq }
  0x13   :  { %v897_v1 = vld [vmem:[#allocation2] sm:$0xff]  ;;  %63 = vadd.xlane.f32.xlu1 %v895_v0  ;;  %v903_v3 = vld [vmem:[#allocation2 + $0x8] sm:$0xff]  ;;  %v907_v4 = vld [vmem:[#allocation2 + $0x30] sm:$0xff]  ;;  %795 = vmatprep.subr.bf16.mxu1 %v849_v11  ;;  %v851_v15 = vmov 0.0   ;;  %vm103_vm1 = vcmask 130112   ;;  %vm110_vm2 = vcmask 195712  }
  0x14   :  { %55 = vadd.xlane.f32.xlu0 %v897_v1  ;;  %v909_v5 = vld [vmem:[#allocation2 + $0x10] sm:$0xff]  ;;  %v917_v6 = vld [vmem:[#allocation2 + $0x38] sm:$0xff]  ;;  %v79_v8 = vld [vmem:[%s1035_s1] sm:$0xff]  ;;  %789 = vmatprep.subr.bf16.mxu0 %v849_v11  ;;  %v93_v23 = vand.u32 127, %v92_v20  ;;  %v945_v28 = vshrl.u32 %v92_v20, 7  ;;  %vm117_vm3 = vcmask 261312  }
  0x15   :  { %v919_v7 = vld [vmem:[#allocation2 + $0x18] sm:$0xff]  ;;  %v80_v9 = vld [vmem:[%s1035_s1 + $0x8] sm:$0xff]  ;;  %v81_v12 = vld [vmem:[%s1035_s1 + $0x10] sm:$0xff]  ;;  %776 = vmatprep.mubr.msk.f32.mxu1 %vm850_vm0, %v851_v15  ;;  %765 = vmatprep.mubr.msk.f32.mxu0 %vm850_vm0, %v851_v15  ;;  %vm138_vm4 = vcmask 1041409   ;;  %vm140_vm5 = vcmask 261120   ;;  %vm338_vm6 = vcmask 1041408  }
  0x16   :  { %v790_v10 = vpack.c.bf16 %v80_v9, %v79_v8  ;;  %v82_v13 = vld [vmem:[%s1035_s1 + $0x18] sm:$0xff]  ;;  %v98_v24 = vadd.s32 4294967288, %v93_v23  ;;  %v105_v25 = vadd.s32 4294967280, %v93_v23  ;;  %v112_v32 = vadd.s32 4294967272, %v93_v23  ;;  %s853_s11 = smov 2   ;;  %s854_s12 = smov 1  }
  0x17   :  { %65 = vadd.xlane.f32.xlu1 %v901_v2  ;;  %v793_v14 = vpack.c.bf16 %v82_v13, %v81_v12  ;;  %v96_v38 = vsub.s32 %v93_v23, %v945_v28  ;;  %vm334_vm7 = vcmask 15360   ;;  %s855_s13 = smov 127   ;;  %s856_s14 = smov 126   ;;  %vm714_vm8 = vcmask 1024  }
  0x18   :  { %57 = vadd.xlane.f32.xlu0 %v903_v3  ;;  %797 = vmatpush3.bf16.msra.mxu1 %v790_v10  ;;  %v101_v29 = vsub.s32 %v98_v24, %v945_v28  ;;  %v108_v33 = vsub.s32 %v105_v25, %v945_v28  ;;  %v115_v43 = vsub.s32 %v112_v32, %v945_v28  ;;  %v83_v25 = vld [vmem:[%s1036_s2] sm:$0x3]  ;;  %s852_s2 = smov 3   ;;  %s857_s15 = smov 125  }
  0x19   :  { %791 = vmatpush3.bf16.msra.mxu0 %v790_v10  ;;  %798 = vmatprep.subr.bf16.mxu1 %v849_v11 }
  0x1a   :  { %792 = vmatprep.subr.bf16.mxu0 %v849_v11 }
  0x1b   :  { %67 = vadd.xlane.f32.xlu1 %v907_v4 }
  0x1c   :  { %59 = vadd.xlane.f32.xlu0 %v909_v5  ;;  %800 = vmatpush3.bf16.msra.mxu1 %v793_v14 }
  0x1d   :  { %794 = vmatpush3.bf16.msra.mxu0 %v793_v14  ;;  %779 = vmatprep.subr.mxu1 %v851_v15 }
  0x1e   :  { %784 = vmatprep.subr.mxu0 %v851_v15 }
  0x1f   :  { %41 = vmax.xlane.f32.xlu1 %v903_v3 }
  0x20   :  { %39 = vmax.xlane.f32.xlu0 %v897_v1 }
  0x23   :  { %49 = vmax.xlane.f32.xlu1 %v901_v2 }
  0x24   :  { %47 = vmax.xlane.f32.xlu0 %v895_v0 }
  0x27   :  { %69 = vadd.xlane.f32.xlu1 %v917_v6 }
  0x28   :  { %61 = vadd.xlane.f32.xlu0 %v919_v7 }
  0x2b   :  { %51 = vmax.xlane.f32.xlu1 %v907_v4 }
  0x2c   :  { %43 = vmax.xlane.f32.xlu0 %v909_v5 }
  0x2f   :  { %53 = vmax.xlane.f32.xlu1 %v917_v6 }
  0x30   :  { %45 = vmax.xlane.f32.xlu0 %v919_v7 }
  0xa0   :  { %v64_v16 = vpop.xlane.xlu1 %63 }
  0xa1   :  { %v56_v17 = vpop.xlane.xlu0 %55  ;;  %v75_v39 = vmul.f32 0.0078125, %v64_v16 }
  0xa2   :  { %v71_v40 = vmul.f32 0.0078125, %v56_v17 }
  0xa3   :  { %v244_v48 = vrot.slane %v75_v39, %v96_v38 }
  0xa4   :  { %v66_v18 = vpop.xlane.xlu1 %65  ;;  %v225_v49 = vrot.slane %v71_v40, %v96_v38  ;;  %v493_v40 = vsub.s32 0, %v945_v28 }
  0xa5   :  { %v58_v19 = vpop.xlane.xlu0 %57  ;;  %v76_v30 = vmul.f32 0.0078125, %v66_v18 }
  0xa6   :  { %v72_v31 = vmul.f32 0.0078125, %v58_v19 }
  0xa7   :  { %v248_v41 = vrot.slane %v76_v30, %v101_v29 }
  0xa8   :  { %v68_v21 = vpop.xlane.xlu1 %67  ;;  %v229_v42 = vrot.slane %v72_v31, %v101_v29 }
  0xa9   :  { %v60_v22 = vpop.xlane.xlu0 %59  ;;  %v77_v34 = vmul.f32 0.0078125, %v68_v21  ;;  %v249_v52 = vsel %vm103_vm1, %v248_v41, %v244_v48 }
  0xaa   :  { %v73_v35 = vmul.f32 0.0078125, %v60_v22  ;;  %v230_v53 = vsel %vm103_vm1, %v229_v42, %v225_v49 }
  0xab   :  { %v253_v44 = vrot.slane %v77_v34, %v108_v33 }
  0xac   :  { %v42_v26 = vpop.xlane.xlu1 %41  ;;  %v234_v45 = vrot.slane %v73_v35, %v108_v33 }
  0xad   :  { %v40_v27 = vpop.xlane.xlu0 %39  ;;  %v254_v56 = vsel %vm110_vm2, %v253_v44, %v249_v52  ;;  %v102_v58 = vrot.slane %v42_v26, %v101_v29 }
  0xae   :  { %v235_v57 = vsel %vm110_vm2, %v234_v45, %v230_v53  ;;  %v97_v59 = vrot.slane %v40_v27, %v96_v38 }
  0xb0   :  { %v50_v36 = vpop.xlane.xlu1 %49  ;;  %v104_v16 = vsel %vm103_vm1, %v102_v58, %v97_v59 }
  0xb1   :  { %v48_v37 = vpop.xlane.xlu0 %47  ;;  %v126_v62 = vrot.slane %v50_v36, %v101_v29 }
  0xb2   :  { %v122_v63 = vrot.slane %v48_v37, %v96_v38 }
  0xb4   :  { %v70_v46 = vpop.xlane.xlu1 %69  ;;  %v127_v17 = vsel %vm103_vm1, %v126_v62, %v122_v63 }
  0xb5   :  { %v62_v47 = vpop.xlane.xlu0 %61  ;;  %v78_v50 = vmul.f32 0.0078125, %v70_v46 }
  0xb6   :  { %v74_v51 = vmul.f32 0.0078125, %v62_v47 }
  0xb7   :  { %v258_v54 = vrot.slane %v78_v50, %v115_v43 }
  0xb8   :  { %v239_v55 = vrot.slane %v74_v51, %v115_v43  ;;  %v52_v60 = vpop.xlane.xlu1 %51 }
  0xb9   :  { %v44_v61 = vpop.xlane.xlu0 %43  ;;  %v259_v9 = vsel %vm117_vm3, %v258_v54, %v254_v56  ;;  %v131_v10 = vrot.slane %v52_v60, %v108_v33 }
  0xba   :  { %v240_v8 = vsel %vm117_vm3, %v239_v55, %v235_v57  ;;  %v109_v11 = vrot.slane %v44_v61, %v108_v33 }
  0xbb   :  { %v260_v12 = vsel %vm138_vm4, %v259_v9, %v240_v8  ;;  %v132_v20 = vsel %vm110_vm2, %v131_v10, %v127_v17 }
  0xbc   :  { %777 = vmatmul.mubr.msk.f32.vlgmr.msra.gmra.mrb[0].mxu1 %vm140_vm5, %v260_v12  ;;  %v54_v13 = vpop.xlane.xlu1 %53  ;;  %v111_v21 = vsel %vm110_vm2, %v109_v11, %v104_v16 }
  0xbd   :  { %v46_v14 = vpop.xlane.xlu0 %45  ;;  %781 = vmatprep.mubr.msk.f32.mxu1 %vm850_vm0, %v851_v15  ;;  %v136_v18 = vrot.slane %v54_v13, %v115_v43  ;;  %780 = vmatpush3.msk.msra.mxu1 %vm338_vm6, %v83_v25 }
  0xbe   :  { %v116_v19 = vrot.slane %v46_v14, %v115_v43  ;;  %v512_v43 = vsub.s32 1, %v945_v28 }
  0xbf   :  { %v137_v22 = vsel %vm117_vm3, %v136_v18, %v132_v20 }
  0xc0   :  { %v118_v23 = vsel %vm117_vm3, %v116_v19, %v111_v21 }
  0xc1   :  { %v139_v24 = vsel %vm138_vm4, %v137_v22, %v118_v23 }
  0xc2   :  { %766 = vmatmul.mubr.msk.f32.vlgmr.msra.gmra.mrb[0].mxu0 %vm140_vm5, %v139_v24 }
  0xc3   :  { %786 = vmatprep.mubr.msk.f32.mxu0 %vm850_vm0, %v851_v15  ;;  %785 = vmatpush3.msk.msra.mxu0 %vm338_vm6, %v83_v25 }
 0x18f   :  { %v329_v26 = vpop.f32.mrb[0].mxu1 }
 0x190   :  { %v333_v27 = vmax.f32 %v329_v26, 0.0  ;;  %v778_v29 = vpop.f32.mrb[1].mxu1 }
 0x192   :  { %782 = vmatmul.mubr.msk.f32.vlgmr.msra.gmra.mrb[2].mxu1 %vm334_vm7, %v333_v27 }
 0x195   :  { %v209_v30 = vpop.f32.mrb[0].mxu0 }
 0x196   :  { %v213_v31 = vmax.f32 %v209_v30, 0.0  ;;  %v767_v32 = vpop.f32.mrb[1].mxu0 }
 0x198   :  { %787 = vmatmul.mubr.msk.f32.vlgmr.msra.gmra.mrb[2].mxu0 %vm334_vm7, %v213_v31 }
 0x265   :  { %v408_v33 = vpop.f32.mrb[2].mxu1 }
 0x266   :  { %v783_v15 = vpop.f32.mrb[3].mxu1 }
 0x26b   :  { %v481_v34 = vpop.f32.mrb[2].mxu0 }
 0x26c   :  { %v482_v35 = vadd.f32 %v481_v34, %v408_v33  ;;  %v788_v36 = vpop.f32.mrb[3].mxu0 }
 0x26e   :  { %v727_v37 = vmul.f32 -1.442695, %v482_v35 }
 0x270   :  { %814 = vpow2.f32 %v727_v37  ;;  %v729_v37 = vld [vmem:[%s1037_s3 + $0x7] ss:$0 sm:$0xff] }
 0x27a   :  { %v815_v38 = vpop.eup %814 }
 0x27b   :  { %v488_v39 = vadd.f32 1.0, %v815_v38  ;;  %v728_v38 = vld [vmem:[%s1037_s3] ss:$0 sm:$0xff] }
 0x27d   :  { %816 = vrcp.f32 %v488_v39 }
 0x287   :  { %v817_v41 = vpop.eup %816 }
 0x288   :  { %v494_v42 = vrot.slane %v817_v41, %v493_v40  ;;  %v513_v44 = vrot.slane %v817_v41, %v512_v43  ;;  %v730_v43 = vld [vmem:[%s1037_s3 + $0x1] ss:$0 sm:$0xff] }
 0x28a   :  { %500 = vbcast.lane.b32.xlu1 %v494_v42, 264  ;;  %496 = vbcast.lane.b32.xlu0 %v494_v42, 256 }
 0x28e   :  { %515 = vbcast.lane.b32.xlu1 %v513_v44, 256  ;;  %504 = vbcast.lane.b32.xlu0 %v494_v42, 272 }
 0x292   :  { %519 = vbcast.lane.b32.xlu1 %v513_v44, 264  ;;  %508 = vbcast.lane.b32.xlu0 %v494_v42, 280 }
 0x296   :  { %523 = vbcast.lane.b32.xlu1 %v513_v44, 272 }
 0x29a   :  { %527 = vbcast.lane.b32.xlu1 %v513_v44, 280  ;;  %v731_v44 = vld [vmem:[%s1037_s3 + $0x8] ss:$0 sm:$0xff] }
 0x2fc   :  { %v501_v45 = vpop.permute.xlu1 %500  ;;  %v497_v46 = vpop.permute.xlu0 %496 }
 0x2fd   :  { %v530_v47 = vmul.f32 %v501_v45, %v903_v3  ;;  %v529_v48 = vmul.f32 %v497_v46, %v897_v1 }
 0x2ff   :  { %v555_v28 = vadd.f32 %v530_v47, %v529_v48 }
 0x300   :  { %v516_v49 = vpop.permute.xlu1 %515  ;;  %v505_v50 = vpop.permute.xlu0 %504 }
 0x301   :  { %v531_v51 = vmul.f32 %v505_v50, %v909_v5  ;;  %v533_v3 = vmul.f32 %v516_v49, %v895_v0  ;;  %v732_v49 = vld [vmem:[%s1037_s3 + $0x2] ss:$0 sm:$0xff] }
 0x303   :  { %v556_v54 = vadd.f32 %v555_v28, %v531_v51  ;;  %v537_v56 = vmax.f32 %v529_v48, %v531_v51  ;;  %v733_v28 = vld [vmem:[%s1037_s3 + $0x9] ss:$0 sm:$0xff] }
 0x304   :  { %v520_v52 = vpop.permute.xlu1 %519  ;;  %v509_v53 = vpop.permute.xlu0 %508 }
 0x305   :  { %v532_v55 = vmul.f32 %v509_v53, %v919_v7  ;;  %v534_v57 = vmul.f32 %v520_v52, %v901_v2 }
 0x307   :  { %v538_v58 = vmax.f32 %v530_v47, %v532_v55  ;;  %v557_v59 = vadd.f32 %v556_v54, %v532_v55  ;;  %v564_v63 = vadd.f32 %v534_v57, %v533_v3 }
 0x308   :  { %v524_v60 = vpop.permute.xlu1 %523 }
 0x309   :  { %v539_v61 = vmax.f32 %v537_v56, %v538_v58  ;;  %v558_v1 = vrot.slane %v557_v59, 4  ;;  %v535_v62 = vmul.f32 %v524_v60, %v907_v4  ;;  %v734_v56 = vld [vmem:[%s1037_s3 + $0x3] ss:$0 sm:$0xff]  ;;  %v735_v60 = vld [vmem:[%s1037_s3 + $0xa] ss:$0 sm:$0xff] }
 0x30b   :  { %v540_v5 = vrot.slane %v539_v61, 4  ;;  %v559_v8 = vadd.f32 %v558_v1, %v557_v59  ;;  %v565_v12 = vadd.f32 %v564_v63, %v535_v62  ;;  %v546_v13 = vmax.f32 %v533_v3, %v535_v62  ;;  %v736_v62 = vld [vmem:[%s1037_s3 + $0x4] ss:$0 sm:$0xff] }
 0x30c   :  { %v528_v9 = vpop.permute.xlu1 %527 }
 0x30d   :  { %v541_v10 = vmax.f32 %v539_v61, %v540_v5  ;;  %v560_v11 = vrot.slane %v559_v8, 2  ;;  %v536_v7 = vmul.f32 %v528_v9, %v917_v6 }
 0x30f   :  { %v547_v2 = vmax.f32 %v534_v57, %v536_v7  ;;  %v566_v14 = vadd.f32 %v565_v12, %v536_v7  ;;  %v542_v16 = vrot.slane %v541_v10, 2  ;;  %v561_v17 = vadd.f32 %v560_v11, %v559_v8  ;;  %v737_v8 = vld [vmem:[%s1037_s3 + $0xb] ss:$0 sm:$0xff]  ;;  %v738_v7 = vld [vmem:[%s1037_s3 + $0x5] ss:$0 sm:$0xff] }
 0x311   :  { %v548_v18 = vmax.f32 %v546_v13, %v547_v2  ;;  %v567_v0 = vrot.slane %v566_v14, 4  ;;  %v543_v21 = vmax.f32 %v541_v10, %v542_v16  ;;  %v562_v4 = vrot.slane %v561_v17, 1 }
 0x313   :  { %v549_v19 = vrot.slane %v548_v18, 4  ;;  %v568_v20 = vadd.f32 %v567_v0, %v566_v14  ;;  %v544_v26 = vrot.slane %v543_v21, 1  ;;  %v563_v27 = vadd.f32 %v562_v4, %v561_v17  ;;  %v739_v14 = vld [vmem:[%s1037_s3 + $0xc] ss:$0 sm:$0xff] }
 0x315   :  { %v550_v22 = vmax.f32 %v548_v18, %v549_v19  ;;  %v569_v23 = vrot.slane %v568_v20, 2  ;;  %v545_v32 = vmax.f32 %v543_v21, %v544_v26  ;;  %v573_v33 = vmul.f32 0.03125, %v563_v27  ;;  %v740_v18 = vld [vmem:[%s1037_s3 + $0x6] ss:$0 sm:$0xff]  ;;  %v741_v21 = vld [vmem:[%s1037_s3 + $0xd] ss:$0 sm:$0xff] }
 0x317   :  { %v551_v24 = vrot.slane %v550_v22, 2  ;;  %v570_v25 = vadd.f32 %v569_v23, %v568_v20 }
 0x319   :  { %v552_v29 = vmax.f32 %v550_v22, %v551_v24  ;;  %v571_v30 = vrot.slane %v570_v25, 1 }
 0x31b   :  { %v553_v6 = vrot.slane %v552_v29, 1  ;;  %v572_v31 = vadd.f32 %v571_v30, %v570_v25 }
 0x31d   :  { %v554_v15 = vmax.f32 %v552_v29, %v553_v6  ;;  %v574_v34 = vmul.f32 0.03125, %v572_v31 }
 0x31f   :  { %v583_v35 = vsel %vm138_vm4, %v574_v34, %v573_v33  ;;  %v577_v36 = vsel %vm138_vm4, %v554_v15, %v545_v32 }
 0x320   :  { %585 = vrot.lane.b32.xlu1 %v583_v35, %s852_s2  ;;  %579 = vrot.lane.b32.xlu0 %v577_v36, %s852_s2  ;;  %v642_v1 = vmul.f32 %v734_v56, %v577_v36  ;;  %v649_v63 = vmul.f32 %v735_v60, %v583_v35 }
 0x324   :  { %603 = vrot.lane.b32.xlu1 %v583_v35, %s853_s11  ;;  %601 = vrot.lane.b32.xlu0 %v577_v36, %s853_s11 }
 0x328   :  { %621 = vrot.lane.b32.xlu1 %v583_v35, %s854_s12  ;;  %619 = vrot.lane.b32.xlu0 %v577_v36, %s854_s12 }
 0x32c   :  { %653 = vrot.lane.b32.xlu1 %v583_v35, %s855_s13  ;;  %651 = vrot.lane.b32.xlu0 %v577_v36, %s855_s13 }
 0x330   :  { %671 = vrot.lane.b32.xlu1 %v583_v35, %s856_s14  ;;  %669 = vrot.lane.b32.xlu0 %v577_v36, %s856_s14 }
 0x334   :  { %689 = vrot.lane.b32.xlu1 %v583_v35, %s857_s15  ;;  %687 = vrot.lane.b32.xlu0 %v577_v36, %s857_s15 }
 0x392   :  { %v586_v39 = vpop.permute.xlu1 %585  ;;  %v580_v40 = vpop.permute.xlu0 %579 }
 0x393   :  { %v599_v41 = vmul.f32 %v729_v37, %v586_v39  ;;  %v592_v42 = vmul.f32 %v728_v38, %v580_v40 }
 0x395   :  { %v600_v47 = vadd.f32 %v599_v41, %v592_v42 }
 0x396   :  { %v604_v45 = vpop.permute.xlu1 %603  ;;  %v602_v46 = vpop.permute.xlu0 %601 }
 0x397   :  { %v610_v48 = vmul.f32 %v730_v43, %v602_v46  ;;  %v617_v50 = vmul.f32 %v731_v44, %v604_v45 }
 0x399   :  { %v611_v51 = vadd.f32 %v610_v48, %v600_v47 }
 0x39a   :  { %v622_v52 = vpop.permute.xlu1 %621  ;;  %v620_v53 = vpop.permute.xlu0 %619 }
 0x39b   :  { %v618_v54 = vadd.f32 %v617_v50, %v611_v51  ;;  %v628_v55 = vmul.f32 %v732_v49, %v620_v53  ;;  %v635_v57 = vmul.f32 %v733_v28, %v622_v52 }
 0x39d   :  { %v629_v58 = vadd.f32 %v628_v55, %v618_v54 }
 0x39e   :  { %v654_v59 = vpop.permute.xlu1 %653  ;;  %v652_v3 = vpop.permute.xlu0 %651 }
 0x39f   :  { %v636_v61 = vadd.f32 %v635_v57, %v629_v58  ;;  %v660_v11 = vmul.f32 %v736_v62, %v652_v3  ;;  %v667_v13 = vmul.f32 %v737_v8, %v654_v59 }
 0x3a1   :  { %v643_v5 = vadd.f32 %v642_v1, %v636_v61 }
 0x3a2   :  { %v670_v9 = vpop.permute.xlu0 %669  ;;  %v672_v12 = vpop.permute.xlu1 %671 }
 0x3a3   :  { %v650_v10 = vadd.f32 %v649_v63, %v643_v5  ;;  %v678_v17 = vmul.f32 %v738_v7, %v670_v9  ;;  %v685_v19 = vmul.f32 %v739_v14, %v672_v12 }
 0x3a5   :  { %v661_v2 = vadd.f32 %v660_v11, %v650_v10 }
 0x3a6   :  { %v688_v0 = vpop.permute.xlu0 %687  ;;  %v690_v4 = vpop.permute.xlu1 %689 }
 0x3a7   :  { %v668_v16 = vadd.f32 %v667_v13, %v661_v2  ;;  %v696_v23 = vmul.f32 %v740_v18, %v688_v0  ;;  %v703_v24 = vmul.f32 %v741_v21, %v690_v4 }
 0x3a9   :  { %v679_v20 = vadd.f32 %v678_v17, %v668_v16 }
 0x3ab   :  { %v686_v22 = vadd.f32 %v685_v19, %v679_v20 }
 0x3ad   :  { %v697_v25 = vadd.f32 %v696_v23, %v686_v22 }
 0x3af   :  { %v704_v26 = vadd.f32 %v703_v24, %v697_v25 }
 0x3b1   :  { %v742_v27 = vmul.f32 -1.442695, %v704_v26 }
 0x3b3   :  { %818 = vpow2.f32 %v742_v27 }
 0x3bd   :  { %v819_v29 = vpop.eup %818 }
 0x3be   :  { %v708_v30 = vadd.f32 1.0, %v819_v29 }
 0x3c0   :  { %820 = vrcp.f32 %v708_v30 }
 0x3ca   :  { %v821_v6 = vpop.eup %820 }
 0x3cb   :  { %v711_v31 = vsel %vm338_vm6, %v821_v6, 0.0 }
 0x3cc   :  { %712 = vadd.xlane.f32.xlu0 %v711_v31 }
 0x459   :  { %v713_v32 = vpop.xlane.xlu0 %712 }
 0x45a   :  { %715 = vst.msk [vmem:[%s1038_s4] sm:$0x3] %vm714_vm8, %v713_v32 }
 0x45b   :  { %720 = vsyncpa [#allocation3], 1 }

// kernel: tpu_custom_call.1
= control target key start
LH: loop header
LB: loop body
LE: loop exit
PB: predicated region body
PF: predicated region fallthrough
CT: control target
= control target key end

     0   :  { %9 = vsyncpa [#allocation3], 0  ;;  %s1440_s0 = inlined_call_operand.hbm [shape: f32[2,32,128], index: 0, kind: input, shape index: {}]   ;;  %s1441_s1 = inlined_call_operand.vmem [shape: f32[2,32], index: 1, kind: input, shape index: {}]   ;;  %s1442_s2 = inlined_call_operand.vmem [shape: f32[32,2], index: 2, kind: input, shape index: {}]   ;;  %s1443_s3 = inlined_call_operand.vmem [shape: f32[2,7], index: 3, kind: input, shape index: {}]   ;;  %s1444_s4 = inlined_call_operand.hbm [shape: f32[1,1], index: 4, kind: output, shape index: {}]  }
   0x1   :  { %11 = vsyncpa [#allocation3 + $0x1], 0 }
   0x2   :  { %12 = vsyncpa [#allocation4], 0  ;;  %s1231_s15 = smov 0   ;;  %s1233_s16 = smov 0  }
   0x3   :  { %s1235_s17 = smov 0   ;;  %s1237_s18 = smov 0  }
   0x4 LB: > { %s1250_s19 = sadd.s32 4294967295, %s1186_s18   ;;  %s1253_s20 = sadd.s32 1, %s1186_s18   ;;  %s1186_s18 = sphi %s1237_s18, %s1451_s18   ;;  %s1182_s17 = sphi %s1235_s17, %s1450_s17   ;;  %s1178_s16 = sphi %s1233_s16, %s1449_s16   ;;  %s1174_s15 = sphi %s1231_s15, %s1448_s15  }
   0x5   : > { %s22_s21 = ssub.s32 %s1186_s18, %s1253_s20  ;;  %s25_s22 = sadd.s32 1, %s1182_s17 }
   0x6   : > { %p23_p0 = scmp.eq.s32.totalorder %s22_s21, 0  ;;  %p32_p1 = scmp.ne.s32.totalorder %s1182_s17, %s1178_s16 }
   0x7   : > { %p33_p2 = scmp.eq.s32.totalorder %s1186_s18, 0  ;;  %p38_p3 = scmp.ne.s32.totalorder %s1178_s16, %s1174_s15 }
   0x8   : > { %s1263_s23 = scalar_select %p23_p0, %s1182_s17, %s25_s22  }
   0x9   : > { %p34_p4 = por %p33_p2, %p32_p1  ;;  %p39_p5 = scmp.eq.s32.totalorder %s1250_s19, 0 }
   0xa   : > { %p1018_p6 = scmp.lt.s32.totalorder %s1186_s18, 2  ;;  %s155_s25 = sand.u32 1, %s1182_s17  }
   0xb   : > { %p1267_p7 = por %p39_p5, %p38_p3  ;;  %s876_s26 = sshll.u32 %s155_s25, 5 }
   0xc   : > { %s903_s27 = sshll.u32 %s1186_s18, 9  ;;  %s159_s5 = scalar_lea.vmem [#allocation2], %s876_s26 }
   0xd   : > { %s1276_s30 = scalar_lea.hbm %s1440_s0, %s903_s27  ;;  %s166_s6 = sshll.u32 %s159_s5, 4  ;;  %s1278_s6 = int_to_ptr.vmem [resolvable:$true] %s166_s6 }
   0xe   : > { %p1280_p8 = pnand %p1018_p6, %p34_p4  ;;  %s1285_s8 = scalar_lea.sflag [#allocation3], %s155_s25 }
   0xf   : > { %s1092_s9 = scalar_lea.hbm %s1276_s30, 512  ;;  %s1097_s12 = scalar_lea.hbm %s1440_s0, 1024 }
  0x10   : > { %p1093_p10 = scmp.ne.s32.totalorder %s1276_s30, %s1092_s9  ;;  %p1094_p11 = pneg %p1280_p8 }
  0x11   : > { %p1098_p0 = scmp.lt.u32.totalorder %s1276_s30, %s1440_s0  ;;  %p1099_p1 = scmp.lt.u32.totalorder %s1097_s12, %s1092_s9 }
  0x12   : > { %p1095_p12 = pnand %p1094_p11, %p1093_p10  ;;  %p1101_p3 = scmp.lt.u32.totalorder %s1092_s9, %s1276_s30 }
  0x13   : > { %p1100_p2 = por %p1099_p1, %p1098_p0 }
  0x14   : > { %p1096_p13 = pneg %p1095_p12 }
  0x15   : > { %p1102_p4 = por %p1101_p3, %p1100_p2 }
  0x17   : > { %p1103_p5 = pnand %p1102_p4, %p1096_p13 }
  0x19   : > { %1106 = shalt.err (!%p1103_p5)
}
  0x1a   : > { %s1107_s15 = scalar_lea.vmem %s1278_s6, 512  ;;  %s1188_s21 = smov [#allocation2]  }
  0x1b   : > { %p1108_p6 = scmp.ne.s32.totalorder %s1278_s6, %s1107_s15  ;;  %s1112_s22 = sshll.u32 %s1188_s21, 4  ;;  %s1113_s22 = int_to_ptr.vmem [resolvable:$false] %s1112_s22 }
  0x1c   : > { %s1114_s25 = scalar_lea.vmem %s1113_s22, 1024  ;;  %p1115_p9 = scmp.lt.s32.totalorder %s1278_s6, %s1113_s22 }
  0x1d   : > { %p1110_p10 = pnand %p1108_p6, %p1094_p11  ;;  %p1116_p0 = scmp.lt.s32.totalorder %s1114_s25, %s1107_s15 }
  0x1f   : > { %p1111_p12 = pneg %p1110_p10  ;;  %p1117_p1 = por %p1116_p0, %p1115_p9 }
  0x21   : > { %p1118_p2 = pnand %p1117_p1, %p1111_p12 }
  0x23   : > { %1121 = shalt.err (!%p1118_p2)
}
  0x24   : > { %s1189_s26 = smov 128   ;;  %s1190_s27 = smov 8  }
  0x25   : > { %1017 = dma.hbm_to_vmem [thread:$0]  (!%p1280_p8), %s1276_s30, 512, %s1278_s6, %s1285_s8, %s1189_s26, %s1189_s26, %s1190_s27  }
  0x26   : > { %p174_p11 = scmp.lt.s32.totalorder %s1186_s18, 3  ;;  %p1447_p13 = scmp.ge.s32.totalorder %s1186_s18, 1 }
  0x28   : > { %p175_p3 = pnand %p1447_p13, %p174_p11 }
  0x29   : > { %s180_s28 = sand.u32 (!%p175_p3), 1, %s1178_s16  }
  0x2a   : > { %178 = sbr.rel (%p175_p3) target bundleno = 1237 (0x4d5), region = 36  ;;  %s880_s29 = sshll.u32 (!%p175_p3), %s180_s28, 5 }
  0x2b   : > { %s181_s5 = scalar_lea.sflag (!%p175_p3), [#allocation3], %s180_s28  ;;  %s184_s9 = scalar_lea.vmem (!%p175_p3), [#allocation2], %s880_s29 }
  0x31   : > { %1165 = dma.done.wait (%p1267_p7), %s181_s5, 512  }
  0x32   : > { %1167 = vsyncadd (%p1267_p7), %s181_s5, 4294966784  ;;  %p881_p9 = scmp.ne.s32.totalorder %s1250_s19, 0 }
  0x33   : > { %vm208_vm0 = vcmask (!%p881_p9), 0   ;;  %v1191_v0 = vmov (!%p881_p9), 0.0  }
  0x34   : > { %207 = sbr.rel (%p881_p9) target bundleno = 59 (0x3b), region = 44  ;;  %209 = vst.msk [vmem:[#allocation5] sm:$0x1] (!%p881_p9), %vm208_vm0, %v1191_v0 }
  0x3b PF: > { %v1322_v1 = vld [vmem:[%s184_s9 + $0x10] sm:$0xff]  ;;  %v1324_v2 = vld [vmem:[%s184_s9] sm:$0xff]  ;;  %v1328_v3 = vld [vmem:[%s184_s9 + $0x18] sm:$0xff]  ;;  %v1192_v5 = vmov 0.0|0.0   ;;  %vm1193_vm1 = vmmov 0   ;;  %v1194_v6 = vmov 0.0  }
  0x3c   : > { %218 = vmax.xlane.f32.xlu1 %v1322_v1  ;;  %214 = vmax.xlane.f32.xlu0 %v1324_v2  ;;  %v1330_v4 = vld [vmem:[%s184_s9 + $0x8] sm:$0xff]  ;;  %v235_v18 = vld [vmem:[%s1441_s1] sm:$0x3]  ;;  %vm240_vm2 = vcmask 261120   ;;  %vm386_vm3 = vcmask 15360   ;;  %vm399_vm4 = vcmask 1041408  }
  0x3d   : > { %962 = vmatprep.subr.bf16.mxu1 %v1192_v5  ;;  %932 = vmatprep.mubr.msk.f32.mxu1 %vm1193_vm1, %v1194_v6  ;;  %v236_v24 = vld [vmem:[%s1442_s2] sm:$0xff]  ;;  %v237_v30 = vld [vmem:[%s1442_s2 + $0x8] sm:$0xff]  ;;  %v238_v32 = vld [vmem:[%s1442_s2 + $0x10] sm:$0xff]  ;;  %v1195_v34 = vmov 0   ;;  %s1196_s21 = smov 125   ;;  %s1197_s22 = smov 124  }
  0x3e   : > { %948 = vmatprep.mubr.msk.f32.mxu0 %vm386_vm3, %v236_v24  ;;  %v239_v33 = vld [vmem:[%s1442_s2 + $0x18] sm:$0xff]  ;;  %1071 = vset.pattern.permute.xlu1 %v1195_v34  ;;  %v644_v35 = vld [vmem:[%s1443_s3] sm:$0x3]  ;;  %s1198_s25 = smov 127   ;;  %s1199_s26 = smov 123   ;;  %vm800_vm11 = vcmask 1040384  }
  0x3f   : > { %1070 = vset.pattern.permute.xlu0 %v1195_v34  ;;  %978 = vpush %v644_v35  ;;  %v661_v36 = vrot.slane %v644_v35, 1  ;;  %s1200_s27 = smov 122   ;;  %s1201_s28 = smov 126   ;;  %vm814_vm12 = vcmask 0  }
  0x40   : > { %220 = vmax.xlane.f32.xlu1 %v1328_v3  ;;  %216 = vmax.xlane.f32.xlu0 %v1330_v4  ;;  %s1202_s29 = smov 3   ;;  %s1203_s5 = smov 2  }
  0x41   : > { %980 = vpush %v661_v36  ;;  %s1204_s9 = smov 1   ;;  %p1019_p7 = scmp.eq.s32.totalorder %s1250_s19, 1 }
  0x44   : > { %224 = vadd.xlane.f32.xlu1 %v1330_v4  ;;  %222 = vadd.xlane.f32.xlu0 %v1324_v2 }
  0x48   : > { %228 = vadd.xlane.f32.xlu1 %v1328_v3  ;;  %226 = vadd.xlane.f32.xlu0 %v1322_v1 }
  0x70   : > { %s979_s18 = spop %978 }
  0x72   : > { %s981_s24 = spop %980 }
  0xc9   : > { %v219_v7 = vpop.xlane.xlu1 %218  ;;  %v215_v8 = vpop.xlane.xlu0 %214 }
  0xcd   : > { %v221_v9 = vpop.xlane.xlu1 %220  ;;  %v217_v10 = vpop.xlane.xlu0 %216 }
  0xce   : > { %v963_v11 = vpack.c.bf16 %v217_v10, %v215_v8  ;;  %v966_v14 = vpack.c.bf16 %v221_v9, %v219_v7 }
  0xd0   : > { %964 = vmatpush3.bf16.msra.mxu1 %v963_v11 }
  0xd1   : > { %v225_v12 = vpop.xlane.xlu1 %224  ;;  %965 = vmatprep.subr.bf16.mxu1 %v1192_v5  ;;  %v223_v13 = vpop.xlane.xlu0 %222 }
  0xd2   : > { %v232_v15 = vmul.f32 0.0078125, %v225_v12  ;;  %v231_v16 = vmul.f32 0.0078125, %v223_v13 }
  0xd4   : > { %v969_v17 = vpack.c.bf16 %v232_v15, %v231_v16  ;;  %967 = vmatpush3.bf16.msra.mxu1 %v966_v14 }
  0xd5   : > { %v229_v19 = vpop.xlane.xlu1 %228  ;;  %968 = vmatprep.subr.bf16.mxu1 %v1192_v5  ;;  %v227_v20 = vpop.xlane.xlu0 %226 }
  0xd6   : > { %v234_v21 = vmul.f32 0.0078125, %v229_v19  ;;  %v233_v22 = vmul.f32 0.0078125, %v227_v20 }
  0xd7   : > { %933 = vmatmul.mubr.msk.f32.vlgmr.msra.gmra.mrb[0].mxu1 %vm240_vm2, %v235_v18 }
  0xd8   : > { %v972_v23 = vpack.c.bf16 %v234_v21, %v233_v22  ;;  %970 = vmatpush3.bf16.msra.mxu1 %v969_v17  ;;  %943 = vmatprep.mubr.msk.f32.mxu1 %vm1193_vm1, %v1194_v6 }
  0xd9   : > { %971 = vmatprep.subr.bf16.mxu1 %v1192_v5 }
  0xdc   : > { %973 = vmatpush3.bf16.msra.mxu1 %v972_v23 }
  0xdf   : > { %944 = vmatmul.mubr.msk.f32.vlgmr.msra.gmra.mrb[2].mxu1 %vm240_vm2, %v235_v18 }
 0x1aa   : > { %v310_v25 = vpop.f32.mrb[0].mxu1 }
 0x1ab   : > { %v934_v26 = vpop.f32.mrb[1].mxu1  ;;  %v314_v31 = vmax.f32 %v310_v25, 0.0 }
 0x1b2   : > { %v381_v27 = vpop.f32.mrb[2].mxu1 }
 0x1b3   : > { %v385_v28 = vmax.f32 %v381_v27, 0.0  ;;  %v945_v29 = vpop.f32.mrb[3].mxu1 }
 0x1b5   : > { %946 = vmatprep.subr.msk.mxu0 %vm399_vm4, %v385_v28 }
 0x1b6   : > { %947 = vmatpush3.msk.msra.mxu0 %vm399_vm4, %v385_v28 }
 0x1b7   : > { %949 = vmatmul.mubr.msk.f32.vlgmr.msra.gmra.mrb[0].mxu0 %vm386_vm3, %v237_v30  ;;  %954 = vmatprep.subr.msk.mxu0 %vm399_vm4, %v314_v31 }
 0x1b8   : > { %955 = vmatpush3.msk.msra.mxu0 %vm399_vm4, %v314_v31  ;;  %951 = vmatprep.mubr.msk.f32.mxu0 %vm386_vm3, %v238_v32 }
 0x1bb   : > { %952 = vmatmul.mubr.msk.f32.gmra.mrb[2].mxu0 %vm386_vm3, %v239_v33 }
 0x1bc   : > { %956 = vmatprep.mubr.msk.f32.mxu0 %vm386_vm3, %v236_v24 }
 0x1bf   : > { %957 = vmatmul.mubr.msk.f32.vlgmr.msra.gmra.mrb[0].mxu0 %vm386_vm3, %v237_v30 }
 0x1c0   : > { %959 = vmatprep.mubr.msk.f32.mxu0 %vm386_vm3, %v238_v32  ;;  %v645_v32 = vlaneseq }
 0x1c3   : > { %960 = vmatmul.mubr.msk.f32.gmra.mrb[2].mxu0 %vm386_vm3, %v239_v33  ;;  %v646_v33 = vand.u32 127, %v645_v32 }
 0x1c5   : > { %v651_v34 = vadd.s32 4294967293, %v646_v33 }
 0x1c7   : > { %vm652_vm5 = vcmp.ge.s32.totalorder %v651_v34, 0 }
 0x292   : > { %v958_v37 = vpop.f32.mrb[0].mxu0 }
 0x293   : > { %v895_v38 = vmul.f32 -1.442695, %v958_v37  ;;  %v557_v39 = vpop.f32.mrb[1].mxu0  ;;  %v663_v37 = vstv %s981_s24 }
 0x294   : > { %v894_v40 = vmul.f32 -1.442695, %v557_v39 }
 0x295   : > { %1072 = vpow2.f32 %v895_v38 }
 0x296   : > { %1074 = vpow2.f32 %v894_v40  ;;  %v961_v41 = vpop.f32.mrb[2].mxu0 }
 0x297   : > { %v897_v42 = vmul.f32 -1.442695, %v961_v41  ;;  %v567_v43 = vpop.f32.mrb[3].mxu0 }
 0x298   : > { %v896_v44 = vmul.f32 -1.442695, %v567_v43 }
 0x299   : > { %1076 = vpow2.f32 %v897_v42 }
 0x29a   : > { %1078 = vpow2.f32 %v896_v44  ;;  %v692_v44 = vadd.s32 4294967295, %v646_v33 }
 0x29c   : > { %vm693_vm7 = vcmp.ge.s32.totalorder %v692_v44, 0 }
 0x29f   : > { %v1073_v45 = vpop.eup %1072 }
 0x2a0   : > { %v1075_v46 = vpop.eup %1074  ;;  %v589_v47 = vadd.f32 1.0, %v1073_v45 }
 0x2a1   : > { %v588_v48 = vadd.f32 1.0, %v1075_v46 }
 0x2a2   : > { %1080 = vrcp.f32 %v589_v47 }
 0x2a3   : > { %v1077_v49 = vpop.eup %1076  ;;  %1082 = vrcp.f32 %v588_v48 }
 0x2a4   : > { %v1079_v50 = vpop.eup %1078  ;;  %v591_v52 = vadd.f32 1.0, %v1077_v49 }
 0x2a5   : > { %v590_v51 = vadd.f32 1.0, %v1079_v50 }
 0x2a7   : > { %1084 = vrcp.f32 %v590_v51 }
 0x2a8   : > { %1086 = vrcp.f32 %v591_v52 }
 0x2ac   : > { %v1081_v53 = vpop.eup %1080 }
 0x2ad   : > { %v1083_v54 = vpop.eup %1082  ;;  %607 = vperm.xlu1 %1071, %v1081_v53  }
 0x2ae   : > { %602 = vperm.xlu0 %1070, %v1083_v54  }
 0x2b1   : > { %v1085_v55 = vpop.eup %1084 }
 0x2b2   : > { %612 = vperm.xlu1 %1071, %v1085_v55   ;;  %721 = vrot.lane.b32.xlu0 %v661_v36, %s1196_s21  ;;  %v1087_v56 = vpop.eup %1086 }
 0x2b6   : > { %617 = vperm.xlu1 %1071, %v1087_v56   ;;  %743 = vrot.lane.b32.xlu0 %v661_v36, %s1197_s22 }
 0x2ba   : > { %676 = vrot.lane.b32.xlu1 %v644_v35, %s1198_s25  ;;  %765 = vrot.lane.b32.xlu0 %v661_v36, %s1199_s26 }
 0x2be   : > { %682 = vrot.lane.b32.xlu1 %v661_v36, %s1198_s25  ;;  %787 = vrot.lane.b32.xlu0 %v661_v36, %s1200_s27 }
 0x2c2   : > { %698 = vrot.lane.b32.xlu1 %v644_v35, %s1201_s28 }
 0x2c6   : > { %704 = vrot.lane.b32.xlu1 %v661_v36, %s1201_s28  ;;  %v658_v36 = vstv %s979_s18 }
 0x2ca   : > { %715 = vrot.lane.b32.xlu1 %v644_v35, %s1196_s21 }
 0x2ce   : > { %737 = vrot.lane.b32.xlu1 %v644_v35, %s1197_s22 }
 0x2d2   : > { %759 = vrot.lane.b32.xlu1 %v644_v35, %s1199_s26  ;;  %s1205_s26 = smov [#allocation5]  }
 0x2d6   : > { %781 = vrot.lane.b32.xlu1 %v644_v35, %s1200_s27  ;;  %v670_v35 = vadd.s32 4294967294, %v646_v33  ;;  %s823_s27 = sshll.u32 %s1205_s26, 4  ;;  %s824_s27 = int_to_ptr.vmem [resolvable:$true] %s823_s27 }
 0x2d7   : > { %p1129_p6 = scmp.lt.s32.totalorder %s824_s27, %s824_s27 }
 0x2d8   : > { %vm671_vm6 = vcmp.ge.s32.totalorder %v670_v35, 0 }
 0x32c   : > { %v608_v57 = vpop.permute.xlu1 %607 }
 0x32d   : > { %v603_v58 = vpop.permute.xlu0 %602  ;;  %v621_v59 = vmul.f32 %v608_v57, %v1330_v4  ;;  %v731_v57 = vadd.s32 1, %v646_v33 }
 0x32e   : > { %v620_v60 = vmul.f32 %v603_v58, %v1324_v2 }
 0x32f   : > { %vm733_vm8 = vcmp.lt.s32.totalorder %v731_v57, 128 }
 0x330   : > { %v633_v63 = vadd.f32 %v621_v59, %v620_v60  ;;  %v624_v7 = vmax.f32 %v620_v60, %v621_v59 }
 0x331   : > { %v613_v61 = vpop.permute.xlu1 %612  ;;  %v722_v21 = vpop.permute.xlu0 %721 }
 0x332   : > { %v622_v62 = vmul.f32 %v613_v61, %v1322_v1 }
 0x334   : > { %v634_v5 = vadd.f32 %v633_v63, %v622_v62 }
 0x335   : > { %v618_v0 = vpop.permute.xlu1 %617  ;;  %v744_v25 = vpop.permute.xlu0 %743 }
 0x336   : > { %v623_v6 = vmul.f32 %v618_v0, %v1328_v3 }
 0x338   : > { %v625_v8 = vmax.f32 %v622_v62, %v623_v6  ;;  %v635_v9 = vadd.f32 %v634_v5, %v623_v6 }
 0x339   : > { %v677_v10 = vpop.permute.xlu1 %676  ;;  %v766_v28 = vpop.permute.xlu0 %765 }
 0x33a   : > { %v626_v11 = vmax.f32 %v624_v7, %v625_v8  ;;  %v636_v12 = vrot.slane %v635_v9, 4  ;;  %982 = vpush %v677_v10 }
 0x33c   : > { %v627_v13 = vrot.slane %v626_v11, 4  ;;  %v637_v14 = vadd.f32 %v636_v12, %v635_v9  ;;  %v753_v9 = vadd.s32 2, %v646_v33 }
 0x33d   : > { %v683_v4 = vpop.permute.xlu1 %682  ;;  %v788_v30 = vpop.permute.xlu0 %787 }
 0x33e   : > { %v628_v15 = vmax.f32 %v626_v11, %v627_v13  ;;  %v638_v2 = vrot.slane %v637_v14, 2  ;;  %984 = vpush %v683_v4  ;;  %vm755_vm9 = vcmp.lt.s32.totalorder %v753_v9, 128 }
 0x340   : > { %v629_v16 = vrot.slane %v628_v15, 2  ;;  %v639_v1 = vadd.f32 %v638_v2, %v637_v14 }
 0x341   : > { %v699_v17 = vpop.permute.xlu1 %698 }
 0x342   : > { %v630_v18 = vmax.f32 %v628_v15, %v629_v16  ;;  %v640_v19 = vrot.slane %v639_v1, 1  ;;  %986 = vpush %v699_v17 }
 0x344   : > { %v631_v3 = vrot.slane %v630_v18, 1  ;;  %v641_v20 = vadd.f32 %v640_v19, %v639_v1  ;;  %v775_v1 = vadd.s32 3, %v646_v33 }
 0x345   : > { %v705_v22 = vpop.permute.xlu1 %704 }
 0x346   : > { %v1376_v23 = vmax.f32 %v630_v18, %v631_v3  ;;  %v1378_v24 = vmul.f32 0.03125, %v641_v20  ;;  %988 = vpush %v705_v22  ;;  %vm777_vm10 = vcmp.lt.s32.totalorder %v775_v1, 128 }
 0x348   : > { %649 = vrot.lane.b32.xlu0 %v1378_v24, %s1202_s29  ;;  %647 = vrot.lane.b32.xlu1 %v1376_v23, %s1202_s29  ;;  %s1128_s29 = scalar_lea.vmem %s824_s27, 32 }
 0x349   : > { %v716_v26 = vpop.permute.xlu1 %715 }
 0x34a   : > { %990 = vpush %v716_v26 }
 0x34b   : > { %992 = vpush %v722_v21 }
 0x34c   : > { %668 = vrot.lane.b32.xlu0 %v1378_v24, %s1203_s5  ;;  %666 = vrot.lane.b32.xlu1 %v1376_v23, %s1203_s5 }
 0x34d   : > { %v738_v27 = vpop.permute.xlu1 %737 }
 0x34e   : > { %994 = vpush %v738_v27 }
 0x34f   : > { %996 = vpush %v744_v25 }
 0x350   : > { %690 = vrot.lane.b32.xlu0 %v1378_v24, %s1204_s9  ;;  %688 = vrot.lane.b32.xlu1 %v1376_v23, %s1204_s9 }
 0x351   : > { %v760_v29 = vpop.permute.xlu1 %759 }
 0x352   : > { %998 = vpush %v760_v29 }
 0x353   : > { %1000 = vpush %v766_v28 }
 0x354   : > { %729 = vrot.lane.b32.xlu0 %v1378_v24, %s1198_s25  ;;  %727 = vrot.lane.b32.xlu1 %v1376_v23, %s1198_s25 }
 0x355   : > { %v782_v31 = vpop.permute.xlu1 %781 }
 0x356   : > { %1002 = vpush %v782_v31 }
 0x357   : > { %1004 = vpush %v788_v30 }
 0x358   : > { %751 = vrot.lane.b32.xlu0 %v1378_v24, %s1201_s28  ;;  %749 = vrot.lane.b32.xlu1 %v1376_v23, %s1201_s28  ;;  %s1122_s28 = scalar_lea.vmem %s824_s27, 16 }
 0x359   : > { %p1123_p8 = scmp.ne.s32.totalorder %s824_s27, %s1122_s28  ;;  %p1130_p10 = scmp.lt.s32.totalorder %s1128_s29, %s1122_s28 }
 0x35b   : > { %p1124_p4 = pnand %p1123_p8, %p1019_p7  ;;  %p1131_p12 = por %p1130_p10, %p1129_p6 }
 0x35c   : > { %773 = vrot.lane.b32.xlu0 %v1378_v24, %s1196_s21  ;;  %771 = vrot.lane.b32.xlu1 %v1376_v23, %s1196_s21 }
 0x35d   : > { %p1125_p5 = pneg %p1124_p4 }
 0x35f   : > { %p1132_p0 = pnand %p1131_p12, %p1125_p5 }
 0x36b   : > { %s983_s30 = spop %982 }
 0x36c   : > { %v679_v47 = vstv %s983_s30 }
 0x36f   : > { %s985_s6 = spop %984 }
 0x370   : > { %v685_v52 = vstv %s985_s6 }
 0x373   : > { %s987_s7 = spop %986 }
 0x374   : > { %v701_v58 = vstv %s987_s7 }
 0x377   : > { %s989_s8 = spop %988 }
 0x378   : > { %v707_v59 = vstv %s989_s8 }
 0x37b   : > { %s991_s10 = spop %990 }
 0x37c   : > { %s993_s11 = spop %992  ;;  %v718_v0 = vstv %s991_s10 }
 0x37d   : > { %v724_v10 = vstv %s993_s11  ;;  %v719_v11 = vmul.f32 %v718_v0, %v1376_v23 }
 0x37e   : > { %v725_v4 = vmul.f32 %v724_v10, %v1378_v24 }
 0x37f   : > { %s995_s12 = spop %994 }
 0x380   : > { %s997_s13 = spop %996  ;;  %v740_v13 = vstv %s995_s12 }
 0x381   : > { %v746_v18 = vstv %s997_s13 }
 0x383   : > { %s999_s14 = spop %998 }
 0x384   : > { %s1001_s15 = spop %1000  ;;  %v762_v20 = vstv %s999_s14 }
 0x385   : > { %v768_v26 = vstv %s1001_s15 }
 0x387   : > { %s1003_s21 = spop %1002 }
 0x388   : > { %s1005_s22 = spop %1004  ;;  %v784_v30 = vstv %s1003_s21 }
 0x389   : > { %v790_v35 = vstv %s1005_s22 }
 0x3ba   : > { %v650_v38 = vpop.permute.xlu0 %649  ;;  %v648_v39 = vpop.permute.xlu1 %647 }
 0x3bb   : > { %v656_v40 = vsel %vm652_vm5, %v650_v38, 0.0  ;;  %v655_v41 = vsel %vm652_vm5, %v648_v39, 0.0 }
 0x3bc   : > { %v664_v42 = vmul.f32 %v663_v37, %v656_v40  ;;  %v659_v43 = vmul.f32 %v658_v36, %v655_v41 }
 0x3be   : > { %v669_v45 = vpop.permute.xlu0 %668  ;;  %v667_v46 = vpop.permute.xlu1 %666  ;;  %v665_v50 = vadd.f32 %v664_v42, %v659_v43 }
 0x3bf   : > { %v675_v48 = vsel %vm671_vm6, %v669_v45, 0.0  ;;  %v674_v49 = vsel %vm671_vm6, %v667_v46, 0.0 }
 0x3c0   : > { %v680_v51 = vmul.f32 %v679_v47, %v674_v49  ;;  %v686_v53 = vmul.f32 %v685_v52, %v675_v48 }
 0x3c2   : > { %v681_v54 = vadd.f32 %v680_v51, %v665_v50  ;;  %v691_v55 = vpop.permute.xlu0 %690  ;;  %v689_v56 = vpop.permute.xlu1 %688 }
 0x3c3   : > { %v697_v60 = vsel %vm693_vm7, %v691_v55, 0.0  ;;  %v696_v61 = vsel %vm693_vm7, %v689_v56, 0.0 }
 0x3c4   : > { %v687_v62 = vadd.f32 %v686_v53, %v681_v54  ;;  %v702_v63 = vmul.f32 %v701_v58, %v696_v61  ;;  %v708_v5 = vmul.f32 %v707_v59, %v697_v60  ;;  %v799_v53 = vld [vmem:[#allocation5] sm:$0x1] }
 0x3c6   : > { %v703_v6 = vadd.f32 %v702_v63, %v687_v62  ;;  %v730_v7 = vpop.permute.xlu0 %729  ;;  %v728_v8 = vpop.permute.xlu1 %727 }
 0x3c7   : > { %v735_v14 = vsel %vm733_vm8, %v728_v8, 0.0  ;;  %v736_v17 = vsel %vm733_vm8, %v730_v7, 0.0 }
 0x3c8   : > { %v709_v12 = vadd.f32 %v708_v5, %v703_v6  ;;  %v741_v3 = vmul.f32 %v740_v13, %v735_v14  ;;  %v747_v22 = vmul.f32 %v746_v18, %v736_v17 }
 0x3ca   : > { %v720_v15 = vadd.f32 %v719_v11, %v709_v12  ;;  %v752_v2 = vpop.permute.xlu0 %751  ;;  %v750_v16 = vpop.permute.xlu1 %749 }
 0x3cb   : > { %v757_v21 = vsel %vm755_vm9, %v750_v16, 0.0  ;;  %v758_v25 = vsel %vm755_vm9, %v752_v2, 0.0 }
 0x3cc   : > { %v726_v19 = vadd.f32 %v725_v4, %v720_v15  ;;  %v763_v28 = vmul.f32 %v762_v20, %v757_v21  ;;  %v769_v32 = vmul.f32 %v768_v26, %v758_v25 }
 0x3ce   : > { %v742_v23 = vadd.f32 %v741_v3, %v726_v19  ;;  %v772_v24 = vpop.permute.xlu1 %771  ;;  %v774_v29 = vpop.permute.xlu0 %773 }
 0x3cf   : > { %v779_v31 = vsel %vm777_vm10, %v772_v24, 0.0  ;;  %v780_v34 = vsel %vm777_vm10, %v774_v29, 0.0 }
 0x3d0   : > { %v748_v27 = vadd.f32 %v747_v22, %v742_v23  ;;  %v785_v37 = vmul.f32 %v784_v30, %v779_v31  ;;  %v791_v38 = vmul.f32 %v790_v35, %v780_v34 }
 0x3d2   : > { %v764_v33 = vadd.f32 %v763_v28, %v748_v27 }
 0x3d4   : > { %v770_v36 = vadd.f32 %v769_v32, %v764_v33 }
 0x3d6   : > { %v786_v39 = vadd.f32 %v785_v37, %v770_v36 }
 0x3d8   : > { %v792_v40 = vadd.f32 %v791_v38, %v786_v39 }
 0x3da   : > { %v898_v41 = vmul.f32 -1.442695, %v792_v40 }
 0x3dc   : > { %1088 = vpow2.f32 %v898_v41 }
 0x3e6   : > { %v1089_v42 = vpop.eup %1088 }
 0x3e7   : > { %v796_v43 = vadd.f32 1.0, %v1089_v42 }
 0x3e9   : > { %1090 = vrcp.f32 %v796_v43 }
 0x3f3   : > { %v1091_v44 = vpop.eup %1090 }
 0x3f4   : > { %v801_v45 = vsel %vm800_vm11, %v1091_v44, 0.0 }
 0x3f5   : > { %802 = vadd.xlane.f32.xlu1 %v801_v45 }
 0x482   : > { %v803_v46 = vpop.xlane.xlu1 %802 }
 0x483   : > { %v804_v47 = vrot.slane %v803_v46, 4 }
 0x485   : > { %v805_v48 = vadd.f32 %v804_v47, %v803_v46 }
 0x487   : > { %v806_v49 = vrot.slane %v805_v48, 2 }
 0x489   : > { %v807_v50 = vadd.f32 %v806_v49, %v805_v48 }
 0x48b   : > { %v808_v51 = vrot.slane %v807_v50, 1 }
 0x48d   : > { %v809_v52 = vadd.f32 %v808_v51, %v807_v50 }
 0x48f   : > { %1006 = vpush %v809_v52 }
 0x4c0   : > { %s1007_s25 = spop %1006 }
 0x4c1   : > { %v811_v54 = vstv %s1007_s25 }
 0x4c2   : > { %v812_v55 = vmul.f32 0.00390625, %v811_v54 }
 0x4c4   : > { %v813_v56 = vadd.f32 %v812_v55, %v799_v53 }
 0x4c6   : > { %815 = vst.msk [vmem:[#allocation5] sm:$0x1] %vm814_vm12, %v813_v56 }
 0x4c7   : > { %1135 = shalt.err (!%p1132_p0)
}
 0x4c8   : > { %s1136_s18 = scalar_lea.hbm %s1444_s4, 16 }
 0x4c9   : > { %p1137_p1 = scmp.ne.s32.totalorder %s1444_s4, %s1136_s18  ;;  %p1142_p13 = scmp.lt.u32.totalorder %s1136_s18, %s1444_s4 }
 0x4cb   : > { %p1138_p2 = pnand %p1137_p1, %p1019_p7 }
 0x4cd   : > { %p1139_p11 = pneg %p1138_p2 }
 0x4cf   : > { %p1144_p3 = pnand %p1142_p13, %p1139_p11 }
 0x4d1   : > { %1147 = shalt.err (!%p1144_p3)
}
 0x4d2   : > { %1011 = dma.vmem_to_hbm [thread:$0]  (%p1019_p7), %s824_s27, 16, %s1444_s4, [#allocation4]  }
 0x4d3   : > { %1169 = dma.done.wait (%p1019_p7), [#allocation4], 16  }
 0x4d4   : > { %1171 = vsyncadd (%p1019_p7), [#allocation4], 4294967280 }
 0x4d5 PF: > { %p15_p9 = scmp.ge.s32.totalorder %s1253_s20, 4   ;;  %s1448_s15 = smov %s1178_s16 }
 0x4d6   : > { %s1449_s16 = smov %s1182_s17  ;;  %s1450_s17 = smov %s1263_s23 }
 0x4d7   : > { %s1451_s18 = smov %s1253_s20  ;;  %17 = sbr.rel (!%p15_p9) target bundleno = 4 (0x4), region = 77 }
 0x4de   :  { %836 = vsyncpa [#allocation3], 1 }
 0x4df   :  { %838 = vsyncpa [#allocation3 + $0x1], 1 }
 0x4e0   :  { %839 = vsyncpa [#allocation4], 1 }
 0x4e1   :  { %841 = vsyncpa [#allocation4 + $0x1], 1 }

</bundles_post_ra>
